<compile_context>
chip_gen: v6e
topology: v6e:2x2x1
jax: 0.10.0
libtpu: 0.0.40
codegen_flags: <defaults>
</compile_context>

<pallas_src>
import functools

import numpy as np

import jax
import jax.numpy as jnp
from jax.experimental import pallas as pl
from jax.experimental.pallas import tpu as pltpu

NEG_SLOPE = 0.01
BN_EPS = 1e-5

BT = 16                  # images per kernel-A grid step (>=6 fills v5e M, >=11 v6e/v7x)
SMALL_BATCH_FUSE = 64    # below this, run the whole net in one pallas_call
MAX_TAIL_BATCH = 256     # whole-batch tail block VMEM cap


# ----------------------------------------------------------------------------
# Shared compute blocks (used by both the fused and the two-kernel paths)
# ----------------------------------------------------------------------------
def _conv1_block(xs, bw, bias_row, slope):
    """conv1 (5x5, 1->10) + 2x2 maxpool + LeakyReLU for a block of images.

    xs: (bt, 28, 28) f32; bw: (140, 256) bf16 pool-ordered banded weight;
    bias_row: (1, 128) f32.  Returns (bt, 12, 128) f32 with lane = ow*10 + oc
    (lanes 120..127 zero).
    """
    bt = xs.shape[0]
    # "im2col" over ki only: 5 shifted row slabs concatenated along lanes.
    x5 = jnp.concatenate([xs[:, ki:ki + 24, :] for ki in range(5)], axis=2)
    x5 = x5.reshape(bt * 24, 140).astype(jnp.bfloat16)
    y = jnp.dot(x5, bw, preferred_element_type=jnp.float32)       # (bt*24, 256)
    m = jnp.maximum(y[:, :128], y[:, 128:])                       # ow-pool (baked)
    m = jnp.max(m.reshape(bt * 12, 2, 128), axis=1)                # oh-pool
    m = m + bias_row                                               # conv1 bias
    m = jnp.where(m >= 0, m, slope * m)                            # LeakyReLU
    return m.reshape(bt, 12, 128)


def _tail_block(h1, w2, w1p, wo, pv, *, n, slope, eps):
    """conv2 + BN2d + pool + LeakyReLU + fc1 + BN1d + ReLU + fc2 + ReLU.

    h1: (n, 12, 128) f32; w2: (5, 128, 256) bf16; w1p: (4, 128, 128) bf16;
    wo: (128, 128) bf16; pv: (8, 128) f32 packed small params.
    Returns (n, 128) f32 (lanes 10.. are zero).
    """
    # ---- conv2 (5x5, 10->20): 5 ki-banded matmuls (kj/ow banded into weight)
    acc = None
    for ki in range(5):
        s = h1[:, ki:ki + 8, :].reshape(n * 8, 128).astype(jnp.bfloat16)
        t = jnp.dot(s, w2[ki], preferred_element_type=jnp.float32)
        acc = t if acc is None else acc + t                        # (n*8, 256)
    # conv2 bias omitted: cancelled exactly by the batch-stat BN below.

    # ---- BatchNorm2d(20), training-mode batch stats, two-pass variance
    inv_cnt = 1.0 / float(n * 8 * 8)
    offs = (0, 20, 40, 60, 128, 148, 168, 188)   # 8 ow-groups of 20 channels
    zpad = jnp.zeros((1, 48), jnp.float32)

    def tile_groups(v20):    # (1, 20) -> (1, 256) matching pool-ordered layout
        return jnp.concatenate([v20] * 4 + [zpad] + [v20] * 4 + [zpad], axis=1)

    csum = jnp.sum(acc, axis=0, keepdims=True)                     # (1, 256)
    ch_s = csum[:, offs[0]:offs[0] + 20]
    for o in offs[1:]:
        ch_s = ch_s + csum[:, o:o + 20]
    mean = ch_s * inv_cnt                                          # (1, 20)
    xc = acc - tile_groups(mean)                                   # centered
    csq = jnp.sum(xc * xc, axis=0, keepdims=True)
    ch_q = csq[:, offs[0]:offs[0] + 20]
    for o in offs[1:]:
        ch_q = ch_q + csq[:, o:o + 20]
    var = jnp.maximum(ch_q * inv_cnt, 0.0)
    scale = pv[0:1, 0:20] * jax.lax.rsqrt(var + eps)               # gamma * inv
    y = xc * tile_groups(scale) + tile_groups(pv[1:2, 0:20])       # (n*8, 256)

    # ---- 2x2 max-pool (ow baked into columns; oh adjacent rows) + LeakyReLU
    m = jnp.maximum(y[:, :128], y[:, 128:])                        # (n*8, 128)
    m = jnp.max(m.reshape(n * 4, 2, 128), axis=1)                  # (n*4, 128)
    h2 = jnp.where(m >= 0, m, slope * m).reshape(n, 4, 128)

    # ---- fc1 (320 -> 50, bias cancelled by BN1d); NCHW flatten folded into w1p
    z = None
    for oh in range(4):
        t = jnp.dot(h2[:, oh, :].astype(jnp.bfloat16), w1p[oh],
                    preferred_element_type=jnp.float32)
        z = t if z is None else z + t                              # (n, 128)

    # ---- BatchNorm1d(50), two-pass variance, then ReLU
    inv_n = 1.0 / float(n)
    mean1 = jnp.sum(z, axis=0, keepdims=True) * inv_n
    zc = z - mean1
    var1 = jnp.maximum(jnp.sum(zc * zc, axis=0, keepdims=True) * inv_n, 0.0)
    z = zc * (jax.lax.rsqrt(var1 + eps) * pv[2:3, :]) + pv[3:4, :]
    z = jnp.maximum(z, 0.0)

    # ---- fc2 (50 -> 10, padded to 128 lanes) + ReLU (as in source forward())
    logits = jnp.dot(z.astype(jnp.bfloat16), wo,
                     preferred_element_type=jnp.float32) + pv[4:5, :]
    return jnp.maximum(logits, 0.0)


# ----------------------------------------------------------------------------
# Kernels
# ----------------------------------------------------------------------------
def _conv1_pool_kernel(x_ref, bw_ref, pv_ref, o_ref, *, slope):
    pv = pv_ref[...]
    o_ref[...] = _conv1_block(x_ref[...], bw_ref[...], pv[5:6, :], slope)


def _tail_kernel(h1_ref, w2_ref, w1p_ref, wo_ref, pv_ref, o_ref,
                 *, n, slope, eps):
    o_ref[...] = _tail_block(h1_ref[...], w2_ref[...], w1p_ref[...],
                             wo_ref[...], pv_ref[...],
                             n=n, slope=slope, eps=eps)


def _fused_kernel(x_ref, bw_ref, w2_ref, w1p_ref, wo_ref, pv_ref, o_ref,
                  *, n, slope, eps):
    pv = pv_ref[...]
    h1 = _conv1_block(x_ref[...], bw_ref[...], pv[5:6, :], slope)
    o_ref[...] = _tail_block(h1, w2_ref[...], w1p_ref[...], wo_ref[...], pv,
                             n=n, slope=slope, eps=eps)


# ----------------------------------------------------------------------------
# Constant-size weight preparation (once per call, outside the hot path)
# ----------------------------------------------------------------------------
def _conv1_banded_weight(w1):
    """(10,1,5,5) -> (140, 256).  Column order bakes the ow-pool:
    col = (ow//2)*10 + oc for even ow, 128 + (ow//2)*10 + oc for odd ow."""
    KI, KJ, OW, OC = np.meshgrid(np.arange(5), np.arange(5), np.arange(24),
                                 np.arange(10), indexing="ij")
    rows = KI * 28 + OW + KJ
    cols = np.where(OW % 2 == 0, (OW // 2) * 10 + OC, 128 + (OW // 2) * 10 + OC)
    vals = w1[:, 0][OC, KI, KJ]                                    # (5,5,24,10)
    return jnp.zeros((140, 256), jnp.float32).at[
        rows.ravel(), cols.ravel()].set(vals.reshape(-1))


def _conv2_banded_weights(w2):
    """(20,10,5,5) -> (5, 128, 256): for each ki a kj/ow-banded weight with
    pool-ordered columns (even|pad|odd|pad); rows 120..127 zero so the
    128-lane-padded h1 slab is used directly."""
    KI, KJ, OW, IC, OC = np.meshgrid(np.arange(5), np.arange(5), np.arange(8),
                                     np.arange(10), np.arange(20), indexing="ij")
    rows = (OW + KJ) * 10 + IC
    cols = np.where(OW % 2 == 0, (OW // 2) * 20 + OC, 128 + (OW // 2) * 20 + OC)
    vals = w2[OC, IC, KI, KJ]                                      # (5,5,8,10,20)
    return jnp.zeros((5, 128, 256), jnp.float32).at[
        KI.ravel(), rows.ravel(), cols.ravel()].set(vals.reshape(-1))


def _fc1_permuted_weight(w):
    """(320, 50) -> (4, 128, 128): fold the PyTorch NCHW .view(-1, 320)
    permutation (idx = oc*16 + oh*4 + ow) into the fc1 weight; rows 80..127 and
    cols 50..127 are zero padding."""
    w4 = w.reshape(20, 4, 4, 50)              # (oc, oh, ow, j)
    w4 = jnp.transpose(w4, (1, 2, 0, 3))      # (oh, ow, oc, j)
    w4 = w4.reshape(4, 80, 50)                # row = ow*20 + oc
    return jnp.pad(w4, ((0, 0), (0, 48), (0, 78)))


def _prepare_weights(params):
    bw = _conv1_banded_weight(params["conv1_w"]).astype(jnp.bfloat16)
    w2 = _conv2_banded_weights(params["conv2_w"]).astype(jnp.bfloat16)
    w1p = _fc1_permuted_weight(params["fc1_w"]).astype(jnp.bfloat16)
    wo = jnp.zeros((128, 128), jnp.float32).at[:50, :10].set(
        params["fc2_w"]).astype(jnp.bfloat16)
    # One (8,128) slab for all small parameter rows (single aligned DMA):
    #   row 0: bn2 gamma   row 1: bn2 beta   row 2: bn1d gamma  row 3: bn1d beta
    #   row 4: fc2 bias    row 5: conv1 bias tiled over the 12 pooled-ow groups
    # conv2_b / fc1_b are intentionally absent: each is followed by a
    # training-mode BatchNorm that subtracts the batch mean, so they cancel
    # exactly and contribute nothing to the forward output.
    pv = jnp.zeros((8, 128), jnp.float32)
    pv = pv.at[0, :20].set(params["bn2_g"])
    pv = pv.at[1, :20].set(params["bn2_b"])
    pv = pv.at[2, :50].set(params["bn1d_g"])
    pv = pv.at[3, :50].set(params["bn1d_b"])
    pv = pv.at[4, :10].set(params["fc2_b"])
    pv = pv.at[5, :120].set(jnp.tile(params["conv1_b"], 12))
    return bw, w2, w1p, wo, pv


# ----------------------------------------------------------------------------
# Parameter init (deterministic, PyTorch-default-style uniform(-1/sqrt(fan_in)))
# ----------------------------------------------------------------------------
def init_params(key):
    ks = jax.random.split(key, 8)

    def unif(k, shape, fan_in):
        bound = 1.0 / jnp.sqrt(fan_in)
        return jax.random.uniform(k, shape, jnp.float32, -bound, bound)

    return {
        "conv1_w": unif(ks[0], (10, 1, 5, 5), 1 * 5 * 5),
        "conv1_b": unif(ks[1], (10,), 1 * 5 * 5),
        "conv2_w": unif(ks[2], (20, 10, 5, 5), 10 * 5 * 5),
        "conv2_b": unif(ks[3], (20,), 10 * 5 * 5),   # unused: cancelled by BN2d
        "bn2_g": jnp.ones((20,), jnp.float32),
        "bn2_b": jnp.zeros((20,), jnp.float32),
        "fc1_w": unif(ks[4], (320, 50), 320),        # stored (in, out)
        "fc1_b": unif(ks[5], (50,), 320),            # unused: cancelled by BN1d
        "bn1d_g": jnp.ones((50,), jnp.float32),
        "bn1d_b": jnp.zeros((50,), jnp.float32),
        "fc2_w": unif(ks[6], (50, 10), 50),
        "fc2_b": unif(ks[7], (10,), 50),
    }


# ----------------------------------------------------------------------------
# Forward passes
# ----------------------------------------------------------------------------
@jax.jit
def _forward_fused(params, x_nchw):
    """Small-batch path: whole network, whole batch, one pallas_call."""
    n = x_nchw.shape[0]
    x = x_nchw.astype(jnp.float32).reshape(n, 28, 28)
    bw, w2, w1p, wo, pv = _prepare_weights(params)
    out = pl.pallas_call(
        functools.partial(_fused_kernel, n=n, slope=NEG_SLOPE, eps=BN_EPS),
        out_shape=jax.ShapeDtypeStruct((n, 128), jnp.float32),
        grid=(1,),
        in_specs=[pl.BlockSpec((n, 28, 28), lambda i: (0, 0, 0)),
                  pl.BlockSpec((140, 256), lambda i: (0, 0)),
                  pl.BlockSpec((5, 128, 256), lambda i: (0, 0, 0)),
                  pl.BlockSpec((4, 128, 128), lambda i: (0, 0, 0)),
                  pl.BlockSpec((128, 128), lambda i: (0, 0)),
                  pl.BlockSpec((8, 128), lambda i: (0, 0))],
        out_specs=pl.BlockSpec((n, 128), lambda i: (0, 0)),
        compiler_params=pltpu.CompilerParams(
            dimension_semantics=("arbitrary",)),
    )(x, bw, w2, w1p, wo, pv)
    return out[:, :10]


@jax.jit
def _forward_two_kernel(params, x_nchw):
    """Large-batch path: batch-parallel conv1 kernel + whole-batch BN tail."""
    n = x_nchw.shape[0]
    if n > MAX_TAIL_BATCH:
        # TODO(synk): two-pass batch-tiled BatchNorm (stats kernel + normalize
        # kernel) to tile the tail over batch for very large n / v7x dual-TC.
        raise NotImplementedError("tail kernel keeps the whole batch resident")
    x = x_nchw.astype(jnp.float32).reshape(n, 28, 28)
    n_pad = -(-n // BT) * BT
    if n_pad != n:
        x = jnp.pad(x, ((0, n_pad - n), (0, 0), (0, 0)))
    bw, w2, w1p, wo, pv = _prepare_weights(params)

    # --- kernel A: conv1 + maxpool + LeakyReLU, BT images per grid step ---
    h1 = pl.pallas_call(
        functools.partial(_conv1_pool_kernel, slope=NEG_SLOPE),
        out_shape=jax.ShapeDtypeStruct((n_pad, 12, 128), jnp.float32),
        grid=(n_pad // BT,),
        in_specs=[pl.BlockSpec((BT, 28, 28), lambda i: (i, 0, 0)),
                  pl.BlockSpec((140, 256), lambda i: (0, 0)),
                  pl.BlockSpec((8, 128), lambda i: (0, 0))],
        out_specs=pl.BlockSpec((BT, 12, 128), lambda i: (i, 0, 0)),
        compiler_params=pltpu.CompilerParams(
            dimension_semantics=("parallel",)),
    )(x, bw, pv)

    # --- kernel B: BatchNorm-coupled tail over the (unpadded) batch ---
    out = pl.pallas_call(
        functools.partial(_tail_kernel, n=n, slope=NEG_SLOPE, eps=BN_EPS),
        out_shape=jax.ShapeDtypeStruct((n, 128), jnp.float32),
        grid=(1,),
        in_specs=[pl.BlockSpec((n, 12, 128), lambda i: (0, 0, 0)),
                  pl.BlockSpec((5, 128, 256), lambda i: (0, 0, 0)),
                  pl.BlockSpec((4, 128, 128), lambda i: (0, 0, 0)),
                  pl.BlockSpec((128, 128), lambda i: (0, 0)),
                  pl.BlockSpec((8, 128), lambda i: (0, 0))],
        out_specs=pl.BlockSpec((n, 128), lambda i: (0, 0)),
        compiler_params=pltpu.CompilerParams(
            dimension_semantics=("arbitrary",),
            vmem_limit_bytes=48 * 1024 * 1024),
    )(h1, w2, w1p, wo, pv)
    return out[:, :10]


def forward(params, x_nchw):
    if x_nchw.shape[0] <= SMALL_BATCH_FUSE:
        return _forward_fused(params, x_nchw)
    return _forward_two_kernel(params, x_nchw)


if __name__ == "__main__":
    key = jax.random.PRNGKey(0)
    k_param, k_x = jax.random.split(key)
    params = init_params(k_param)
    x = jax.random.normal(k_x, (2, 1, 28, 28), jnp.float32)       # NCHW input

    out = forward(params, x)                 # n=2 -> fully fused single call
    jax.block_until_ready(out)
    assert out.shape == (2, 10) and out.dtype == jnp.float32
    assert bool(jnp.all(jnp.isfinite(out)))

    # Also exercise the batched-conv1 + whole-batch-tail path on the same data.
    out2 = _forward_two_kernel(params, x)
    jax.block_until_ready(out2)
    assert out2.shape == (2, 10)
    assert bool(jnp.all(jnp.isfinite(out2)))
    assert bool(jnp.allclose(out, out2, rtol=1e-2, atol=1e-2))

    print("KERNEL_OK")
</pallas_src>

<mosaic_0001>
module attributes {stable_mosaic.version = 11 : i64} {
  func.func @_fused_kernel(%arg0: i32, %arg1: memref<2x28x28xf32, #tpu.memory_space<vmem>>, %arg2: memref<140x256xbf16, #tpu.memory_space<vmem>>, %arg3: memref<5x128x256xbf16, #tpu.memory_space<vmem>>, %arg4: memref<4x128x128xbf16, #tpu.memory_space<vmem>>, %arg5: memref<128x128xbf16, #tpu.memory_space<vmem>>, %arg6: memref<8x128xf32, #tpu.memory_space<vmem>>, %arg7: memref<2x128xf32, #tpu.memory_space<vmem>>) attributes {dimension_semantics = [#tpu.dimension_semantics<arbitrary>], iteration_bounds = array<i64: 1>, scalar_prefetch = 0 : i64, scratch_operands = 0 : i64, tpu.core_type = #tpu.core_type<tc>, window_params = [{pipeline_mode = #tpu.pipeline_mode<synchronous>, transform_indices = @transform_0, window_bounds = array<i64: 2, 28, 28>}, {pipeline_mode = #tpu.pipeline_mode<synchronous>, transform_indices = @transform_1, window_bounds = array<i64: 140, 256>}, {pipeline_mode = #tpu.pipeline_mode<synchronous>, transform_indices = @transform_2, window_bounds = array<i64: 5, 128, 256>}, {pipeline_mode = #tpu.pipeline_mode<synchronous>, transform_indices = @transform_3, window_bounds = array<i64: 4, 128, 128>}, {pipeline_mode = #tpu.pipeline_mode<synchronous>, transform_indices = @transform_4, window_bounds = array<i64: 128, 128>}, {pipeline_mode = #tpu.pipeline_mode<synchronous>, transform_indices = @transform_5, window_bounds = array<i64: 8, 128>}, {pipeline_mode = #tpu.pipeline_mode<synchronous>, transform_indices = @transform_6, window_bounds = array<i64: 2, 128>}]} {
    %c0 = arith.constant 0 : index
    %c0_0 = arith.constant 0 : index
    %0 = vector.load %arg6[%c0, %c0_0] : memref<8x128xf32, #tpu.memory_space<vmem>>, vector<8x128xf32>
    %c0_1 = arith.constant 0 : index
    %c0_2 = arith.constant 0 : index
    %c0_3 = arith.constant 0 : index
    %1 = vector.load %arg1[%c0_1, %c0_2, %c0_3] : memref<2x28x28xf32, #tpu.memory_space<vmem>>, vector<2x28x28xf32>
    %c0_4 = arith.constant 0 : index
    %c0_5 = arith.constant 0 : index
    %2 = vector.load %arg2[%c0_4, %c0_5] : memref<140x256xbf16, #tpu.memory_space<vmem>>, vector<140x256xbf16>
    %3 = vector.extract_strided_slice %0 {offsets = [5, 0], sizes = [1, 128], strides = [1, 1]} : vector<8x128xf32> to vector<1x128xf32>
    %4 = vector.extract_strided_slice %1 {offsets = [0, 0, 0], sizes = [2, 24, 28], strides = [1, 1, 1]} : vector<2x28x28xf32> to vector<2x24x28xf32>
    %5 = vector.extract_strided_slice %1 {offsets = [0, 1, 0], sizes = [2, 24, 28], strides = [1, 1, 1]} : vector<2x28x28xf32> to vector<2x24x28xf32>
    %6 = vector.extract_strided_slice %1 {offsets = [0, 2, 0], sizes = [2, 24, 28], strides = [1, 1, 1]} : vector<2x28x28xf32> to vector<2x24x28xf32>
    %7 = vector.extract_strided_slice %1 {offsets = [0, 3, 0], sizes = [2, 24, 28], strides = [1, 1, 1]} : vector<2x28x28xf32> to vector<2x24x28xf32>
    %8 = vector.extract_strided_slice %1 {offsets = [0, 4, 0], sizes = [2, 24, 28], strides = [1, 1, 1]} : vector<2x28x28xf32> to vector<2x24x28xf32>
    %9 = tpu.concatenate %4, %5, %6, %7, %8 in 2 : vector<2x24x28xf32>, vector<2x24x28xf32>, vector<2x24x28xf32>, vector<2x24x28xf32>, vector<2x24x28xf32> -> vector<2x24x140xf32>
    %10 = vector.shape_cast %9 : vector<2x24x140xf32> to vector<48x140xf32>
    %11 = arith.truncf %10 : vector<48x140xf32> to vector<48x140xbf16>
    %cst = arith.constant dense<0.000000e+00> : vector<48x256xf32>
    %12 = tpu.matmul %11, %2, %cst {dimension_numbers = #tpu.dot_dimension_numbers<[1], [0], [0], [1], [0, 0, 1, 1], [], []>} : vector<48x140xbf16>, vector<140x256xbf16>, vector<48x256xf32> -> vector<48x256xf32>
    %13 = vector.extract_strided_slice %12 {offsets = [0, 0], sizes = [48, 128], strides = [1, 1]} : vector<48x256xf32> to vector<48x128xf32>
    %14 = vector.extract_strided_slice %12 {offsets = [0, 128], sizes = [48, 128], strides = [1, 1]} : vector<48x256xf32> to vector<48x128xf32>
    %15 = arith.maximumf %13, %14 : vector<48x128xf32>
    %16 = vector.shape_cast %15 : vector<48x128xf32> to vector<24x2x128xf32>
    %cst_6 = arith.constant dense<0xFF800000> : vector<24x128xf32>
    %17 = vector.multi_reduction <maximumf>, %16, %cst_6 [1] : vector<24x2x128xf32> to vector<24x128xf32>
    %18 = vector.broadcast %3 : vector<1x128xf32> to vector<24x128xf32>
    %19 = arith.addf %17, %18 : vector<24x128xf32>
    %cst_7 = arith.constant 0.000000e+00 : f32
    %20 = vector.broadcast %cst_7 : f32 to vector<24x128xf32>
    %21 = arith.cmpf oge, %19, %20 : vector<24x128xf32>
    %cst_8 = arith.constant 0.00999999977 : f32
    %22 = vector.broadcast %cst_8 : f32 to vector<24x128xf32>
    %23 = arith.mulf %22, %19 : vector<24x128xf32>
    %24 = arith.select %21, %19, %23 : vector<24x128xi1>, vector<24x128xf32>
    %25 = vector.shape_cast %24 : vector<24x128xf32> to vector<2x12x128xf32>
    %c0_9 = arith.constant 0 : index
    %c0_10 = arith.constant 0 : index
    %c0_11 = arith.constant 0 : index
    %26 = vector.load %arg3[%c0_9, %c0_10, %c0_11] : memref<5x128x256xbf16, #tpu.memory_space<vmem>>, vector<5x128x256xbf16>
    %c0_12 = arith.constant 0 : index
    %c0_13 = arith.constant 0 : index
    %c0_14 = arith.constant 0 : index
    %27 = vector.load %arg4[%c0_12, %c0_13, %c0_14] : memref<4x128x128xbf16, #tpu.memory_space<vmem>>, vector<4x128x128xbf16>
    %c0_15 = arith.constant 0 : index
    %c0_16 = arith.constant 0 : index
    %28 = vector.load %arg5[%c0_15, %c0_16] : memref<128x128xbf16, #tpu.memory_space<vmem>>, vector<128x128xbf16>
    %29 = vector.extract_strided_slice %25 {offsets = [0, 0, 0], sizes = [2, 8, 128], strides = [1, 1, 1]} : vector<2x12x128xf32> to vector<2x8x128xf32>
    %30 = vector.shape_cast %29 : vector<2x8x128xf32> to vector<16x128xf32>
    %31 = arith.truncf %30 : vector<16x128xf32> to vector<16x128xbf16>
    %32 = vector.extract_strided_slice %26 {offsets = [0, 0, 0], sizes = [1, 128, 256], strides = [1, 1, 1]} : vector<5x128x256xbf16> to vector<1x128x256xbf16>
    %33 = vector.shape_cast %32 : vector<1x128x256xbf16> to vector<128x256xbf16>
    %cst_17 = arith.constant dense<0.000000e+00> : vector<16x256xf32>
    %34 = tpu.matmul %31, %33, %cst_17 {dimension_numbers = #tpu.dot_dimension_numbers<[1], [0], [0], [1], [0, 0, 1, 1], [], []>} : vector<16x128xbf16>, vector<128x256xbf16>, vector<16x256xf32> -> vector<16x256xf32>
    %35 = vector.extract_strided_slice %25 {offsets = [0, 1, 0], sizes = [2, 8, 128], strides = [1, 1, 1]} : vector<2x12x128xf32> to vector<2x8x128xf32>
    %36 = vector.shape_cast %35 : vector<2x8x128xf32> to vector<16x128xf32>
    %37 = arith.truncf %36 : vector<16x128xf32> to vector<16x128xbf16>
    %38 = vector.extract_strided_slice %26 {offsets = [1, 0, 0], sizes = [1, 128, 256], strides = [1, 1, 1]} : vector<5x128x256xbf16> to vector<1x128x256xbf16>
    %39 = vector.shape_cast %38 : vector<1x128x256xbf16> to vector<128x256xbf16>
    %cst_18 = arith.constant dense<0.000000e+00> : vector<16x256xf32>
    %40 = tpu.matmul %37, %39, %cst_18 {dimension_numbers = #tpu.dot_dimension_numbers<[1], [0], [0], [1], [0, 0, 1, 1], [], []>} : vector<16x128xbf16>, vector<128x256xbf16>, vector<16x256xf32> -> vector<16x256xf32>
    %41 = arith.addf %34, %40 : vector<16x256xf32>
    %42 = vector.extract_strided_slice %25 {offsets = [0, 2, 0], sizes = [2, 8, 128], strides = [1, 1, 1]} : vector<2x12x128xf32> to vector<2x8x128xf32>
    %43 = vector.shape_cast %42 : vector<2x8x128xf32> to vector<16x128xf32>
    %44 = arith.truncf %43 : vector<16x128xf32> to vector<16x128xbf16>
    %45 = vector.extract_strided_slice %26 {offsets = [2, 0, 0], sizes = [1, 128, 256], strides = [1, 1, 1]} : vector<5x128x256xbf16> to vector<1x128x256xbf16>
    %46 = vector.shape_cast %45 : vector<1x128x256xbf16> to vector<128x256xbf16>
    %cst_19 = arith.constant dense<0.000000e+00> : vector<16x256xf32>
    %47 = tpu.matmul %44, %46, %cst_19 {dimension_numbers = #tpu.dot_dimension_numbers<[1], [0], [0], [1], [0, 0, 1, 1], [], []>} : vector<16x128xbf16>, vector<128x256xbf16>, vector<16x256xf32> -> vector<16x256xf32>
    %48 = arith.addf %41, %47 : vector<16x256xf32>
    %49 = vector.extract_strided_slice %25 {offsets = [0, 3, 0], sizes = [2, 8, 128], strides = [1, 1, 1]} : vector<2x12x128xf32> to vector<2x8x128xf32>
    %50 = vector.shape_cast %49 : vector<2x8x128xf32> to vector<16x128xf32>
    %51 = arith.truncf %50 : vector<16x128xf32> to vector<16x128xbf16>
    %52 = vector.extract_strided_slice %26 {offsets = [3, 0, 0], sizes = [1, 128, 256], strides = [1, 1, 1]} : vector<5x128x256xbf16> to vector<1x128x256xbf16>
    %53 = vector.shape_cast %52 : vector<1x128x256xbf16> to vector<128x256xbf16>
    %cst_20 = arith.constant dense<0.000000e+00> : vector<16x256xf32>
    %54 = tpu.matmul %51, %53, %cst_20 {dimension_numbers = #tpu.dot_dimension_numbers<[1], [0], [0], [1], [0, 0, 1, 1], [], []>} : vector<16x128xbf16>, vector<128x256xbf16>, vector<16x256xf32> -> vector<16x256xf32>
    %55 = arith.addf %48, %54 : vector<16x256xf32>
    %56 = vector.extract_strided_slice %25 {offsets = [0, 4, 0], sizes = [2, 8, 128], strides = [1, 1, 1]} : vector<2x12x128xf32> to vector<2x8x128xf32>
    %57 = vector.shape_cast %56 : vector<2x8x128xf32> to vector<16x128xf32>
    %58 = arith.truncf %57 : vector<16x128xf32> to vector<16x128xbf16>
    %59 = vector.extract_strided_slice %26 {offsets = [4, 0, 0], sizes = [1, 128, 256], strides = [1, 1, 1]} : vector<5x128x256xbf16> to vector<1x128x256xbf16>
    %60 = vector.shape_cast %59 : vector<1x128x256xbf16> to vector<128x256xbf16>
    %cst_21 = arith.constant dense<0.000000e+00> : vector<16x256xf32>
    %61 = tpu.matmul %58, %60, %cst_21 {dimension_numbers = #tpu.dot_dimension_numbers<[1], [0], [0], [1], [0, 0, 1, 1], [], []>} : vector<16x128xbf16>, vector<128x256xbf16>, vector<16x256xf32> -> vector<16x256xf32>
    %62 = arith.addf %55, %61 : vector<16x256xf32>
    %cst_22 = arith.constant 0.000000e+00 : f32
    %63 = vector.broadcast %cst_22 : f32 to vector<1x48xf32>
    %cst_23 = arith.constant dense<0.000000e+00> : vector<256xf32>
    %64 = vector.multi_reduction <add>, %62, %cst_23 [0] : vector<16x256xf32> to vector<256xf32>
    %65 = vector.shape_cast %64 : vector<256xf32> to vector<1x256xf32>
    %66 = vector.extract_strided_slice %65 {offsets = [0, 0], sizes = [1, 20], strides = [1, 1]} : vector<1x256xf32> to vector<1x20xf32>
    %67 = vector.extract_strided_slice %65 {offsets = [0, 20], sizes = [1, 20], strides = [1, 1]} : vector<1x256xf32> to vector<1x20xf32>
    %68 = arith.addf %66, %67 : vector<1x20xf32>
    %69 = vector.extract_strided_slice %65 {offsets = [0, 40], sizes = [1, 20], strides = [1, 1]} : vector<1x256xf32> to vector<1x20xf32>
    %70 = arith.addf %68, %69 : vector<1x20xf32>
    %71 = vector.extract_strided_slice %65 {offsets = [0, 60], sizes = [1, 20], strides = [1, 1]} : vector<1x256xf32> to vector<1x20xf32>
    %72 = arith.addf %70, %71 : vector<1x20xf32>
    %73 = vector.extract_strided_slice %65 {offsets = [0, 128], sizes = [1, 20], strides = [1, 1]} : vector<1x256xf32> to vector<1x20xf32>
    %74 = arith.addf %72, %73 : vector<1x20xf32>
    %75 = vector.extract_strided_slice %65 {offsets = [0, 148], sizes = [1, 20], strides = [1, 1]} : vector<1x256xf32> to vector<1x20xf32>
    %76 = arith.addf %74, %75 : vector<1x20xf32>
    %77 = vector.extract_strided_slice %65 {offsets = [0, 168], sizes = [1, 20], strides = [1, 1]} : vector<1x256xf32> to vector<1x20xf32>
    %78 = arith.addf %76, %77 : vector<1x20xf32>
    %79 = vector.extract_strided_slice %65 {offsets = [0, 188], sizes = [1, 20], strides = [1, 1]} : vector<1x256xf32> to vector<1x20xf32>
    %80 = arith.addf %78, %79 : vector<1x20xf32>
    %cst_24 = arith.constant 7.812500e-03 : f32
    %81 = vector.broadcast %cst_24 : f32 to vector<1x20xf32>
    %82 = arith.mulf %80, %81 : vector<1x20xf32>
    %83 = tpu.concatenate %82, %82, %82, %82, %63, %82, %82, %82, %82, %63 in 1 : vector<1x20xf32>, vector<1x20xf32>, vector<1x20xf32>, vector<1x20xf32>, vector<1x48xf32>, vector<1x20xf32>, vector<1x20xf32>, vector<1x20xf32>, vector<1x20xf32>, vector<1x48xf32> -> vector<1x256xf32>
    %84 = vector.broadcast %83 : vector<1x256xf32> to vector<16x256xf32>
    %85 = arith.subf %62, %84 : vector<16x256xf32>
    %86 = arith.mulf %85, %85 : vector<16x256xf32>
    %cst_25 = arith.constant dense<0.000000e+00> : vector<256xf32>
    %87 = vector.multi_reduction <add>, %86, %cst_25 [0] : vector<16x256xf32> to vector<256xf32>
    %88 = vector.shape_cast %87 : vector<256xf32> to vector<1x256xf32>
    %89 = vector.extract_strided_slice %88 {offsets = [0, 0], sizes = [1, 20], strides = [1, 1]} : vector<1x256xf32> to vector<1x20xf32>
    %90 = vector.extract_strided_slice %88 {offsets = [0, 20], sizes = [1, 20], strides = [1, 1]} : vector<1x256xf32> to vector<1x20xf32>
    %91 = arith.addf %89, %90 : vector<1x20xf32>
    %92 = vector.extract_strided_slice %88 {offsets = [0, 40], sizes = [1, 20], strides = [1, 1]} : vector<1x256xf32> to vector<1x20xf32>
    %93 = arith.addf %91, %92 : vector<1x20xf32>
    %94 = vector.extract_strided_slice %88 {offsets = [0, 60], sizes = [1, 20], strides = [1, 1]} : vector<1x256xf32> to vector<1x20xf32>
    %95 = arith.addf %93, %94 : vector<1x20xf32>
    %96 = vector.extract_strided_slice %88 {offsets = [0, 128], sizes = [1, 20], strides = [1, 1]} : vector<1x256xf32> to vector<1x20xf32>
    %97 = arith.addf %95, %96 : vector<1x20xf32>
    %98 = vector.extract_strided_slice %88 {offsets = [0, 148], sizes = [1, 20], strides = [1, 1]} : vector<1x256xf32> to vector<1x20xf32>
    %99 = arith.addf %97, %98 : vector<1x20xf32>
    %100 = vector.extract_strided_slice %88 {offsets = [0, 168], sizes = [1, 20], strides = [1, 1]} : vector<1x256xf32> to vector<1x20xf32>
    %101 = arith.addf %99, %100 : vector<1x20xf32>
    %102 = vector.extract_strided_slice %88 {offsets = [0, 188], sizes = [1, 20], strides = [1, 1]} : vector<1x256xf32> to vector<1x20xf32>
    %103 = arith.addf %101, %102 : vector<1x20xf32>
    %cst_26 = arith.constant 7.812500e-03 : f32
    %104 = vector.broadcast %cst_26 : f32 to vector<1x20xf32>
    %105 = arith.mulf %103, %104 : vector<1x20xf32>
    %cst_27 = arith.constant 0.000000e+00 : f32
    %106 = vector.broadcast %cst_27 : f32 to vector<1x20xf32>
    %107 = arith.maximumf %105, %106 : vector<1x20xf32>
    %108 = vector.extract_strided_slice %0 {offsets = [0, 0], sizes = [1, 20], strides = [1, 1]} : vector<8x128xf32> to vector<1x20xf32>
    %cst_28 = arith.constant 9.99999974E-6 : f32
    %109 = vector.broadcast %cst_28 : f32 to vector<1x20xf32>
    %110 = arith.addf %107, %109 : vector<1x20xf32>
    %111 = math.rsqrt %110 : vector<1x20xf32>
    %112 = arith.mulf %108, %111 : vector<1x20xf32>
    %113 = tpu.concatenate %112, %112, %112, %112, %63, %112, %112, %112, %112, %63 in 1 : vector<1x20xf32>, vector<1x20xf32>, vector<1x20xf32>, vector<1x20xf32>, vector<1x48xf32>, vector<1x20xf32>, vector<1x20xf32>, vector<1x20xf32>, vector<1x20xf32>, vector<1x48xf32> -> vector<1x256xf32>
    %114 = vector.broadcast %113 : vector<1x256xf32> to vector<16x256xf32>
    %115 = arith.mulf %85, %114 : vector<16x256xf32>
    %116 = vector.extract_strided_slice %0 {offsets = [1, 0], sizes = [1, 20], strides = [1, 1]} : vector<8x128xf32> to vector<1x20xf32>
    %117 = tpu.concatenate %116, %116, %116, %116, %63, %116, %116, %116, %116, %63 in 1 : vector<1x20xf32>, vector<1x20xf32>, vector<1x20xf32>, vector<1x20xf32>, vector<1x48xf32>, vector<1x20xf32>, vector<1x20xf32>, vector<1x20xf32>, vector<1x20xf32>, vector<1x48xf32> -> vector<1x256xf32>
    %118 = vector.broadcast %117 : vector<1x256xf32> to vector<16x256xf32>
    %119 = arith.addf %115, %118 : vector<16x256xf32>
    %120 = vector.extract_strided_slice %119 {offsets = [0, 0], sizes = [16, 128], strides = [1, 1]} : vector<16x256xf32> to vector<16x128xf32>
    %121 = vector.extract_strided_slice %119 {offsets = [0, 128], sizes = [16, 128], strides = [1, 1]} : vector<16x256xf32> to vector<16x128xf32>
    %122 = arith.maximumf %120, %121 : vector<16x128xf32>
    %123 = vector.shape_cast %122 : vector<16x128xf32> to vector<8x2x128xf32>
    %cst_29 = arith.constant dense<0xFF800000> : vector<8x128xf32>
    %124 = vector.multi_reduction <maximumf>, %123, %cst_29 [1] : vector<8x2x128xf32> to vector<8x128xf32>
    %cst_30 = arith.constant 0.000000e+00 : f32
    %125 = vector.broadcast %cst_30 : f32 to vector<8x128xf32>
    %126 = arith.cmpf oge, %124, %125 : vector<8x128xf32>
    %cst_31 = arith.constant 0.00999999977 : f32
    %127 = vector.broadcast %cst_31 : f32 to vector<8x128xf32>
    %128 = arith.mulf %127, %124 : vector<8x128xf32>
    %129 = arith.select %126, %124, %128 : vector<8x128xi1>, vector<8x128xf32>
    %130 = vector.shape_cast %129 : vector<8x128xf32> to vector<2x4x128xf32>
    %131 = vector.extract_strided_slice %130 {offsets = [0, 0, 0], sizes = [2, 1, 128], strides = [1, 1, 1]} : vector<2x4x128xf32> to vector<2x1x128xf32>
    %132 = vector.shape_cast %131 : vector<2x1x128xf32> to vector<2x128xf32>
    %133 = arith.truncf %132 : vector<2x128xf32> to vector<2x128xbf16>
    %134 = vector.extract_strided_slice %27 {offsets = [0, 0, 0], sizes = [1, 128, 128], strides = [1, 1, 1]} : vector<4x128x128xbf16> to vector<1x128x128xbf16>
    %135 = vector.shape_cast %134 : vector<1x128x128xbf16> to vector<128x128xbf16>
    %cst_32 = arith.constant dense<0.000000e+00> : vector<2x128xf32>
    %136 = tpu.matmul %133, %135, %cst_32 {dimension_numbers = #tpu.dot_dimension_numbers<[1], [0], [0], [1], [0, 0, 1, 1], [], []>} : vector<2x128xbf16>, vector<128x128xbf16>, vector<2x128xf32> -> vector<2x128xf32>
    %137 = vector.extract_strided_slice %130 {offsets = [0, 1, 0], sizes = [2, 1, 128], strides = [1, 1, 1]} : vector<2x4x128xf32> to vector<2x1x128xf32>
    %138 = vector.shape_cast %137 : vector<2x1x128xf32> to vector<2x128xf32>
    %139 = arith.truncf %138 : vector<2x128xf32> to vector<2x128xbf16>
    %140 = vector.extract_strided_slice %27 {offsets = [1, 0, 0], sizes = [1, 128, 128], strides = [1, 1, 1]} : vector<4x128x128xbf16> to vector<1x128x128xbf16>
    %141 = vector.shape_cast %140 : vector<1x128x128xbf16> to vector<128x128xbf16>
    %cst_33 = arith.constant dense<0.000000e+00> : vector<2x128xf32>
    %142 = tpu.matmul %139, %141, %cst_33 {dimension_numbers = #tpu.dot_dimension_numbers<[1], [0], [0], [1], [0, 0, 1, 1], [], []>} : vector<2x128xbf16>, vector<128x128xbf16>, vector<2x128xf32> -> vector<2x128xf32>
    %143 = arith.addf %136, %142 : vector<2x128xf32>
    %144 = vector.extract_strided_slice %130 {offsets = [0, 2, 0], sizes = [2, 1, 128], strides = [1, 1, 1]} : vector<2x4x128xf32> to vector<2x1x128xf32>
    %145 = vector.shape_cast %144 : vector<2x1x128xf32> to vector<2x128xf32>
    %146 = arith.truncf %145 : vector<2x128xf32> to vector<2x128xbf16>
    %147 = vector.extract_strided_slice %27 {offsets = [2, 0, 0], sizes = [1, 128, 128], strides = [1, 1, 1]} : vector<4x128x128xbf16> to vector<1x128x128xbf16>
    %148 = vector.shape_cast %147 : vector<1x128x128xbf16> to vector<128x128xbf16>
    %cst_34 = arith.constant dense<0.000000e+00> : vector<2x128xf32>
    %149 = tpu.matmul %146, %148, %cst_34 {dimension_numbers = #tpu.dot_dimension_numbers<[1], [0], [0], [1], [0, 0, 1, 1], [], []>} : vector<2x128xbf16>, vector<128x128xbf16>, vector<2x128xf32> -> vector<2x128xf32>
    %150 = arith.addf %143, %149 : vector<2x128xf32>
    %151 = vector.extract_strided_slice %130 {offsets = [0, 3, 0], sizes = [2, 1, 128], strides = [1, 1, 1]} : vector<2x4x128xf32> to vector<2x1x128xf32>
    %152 = vector.shape_cast %151 : vector<2x1x128xf32> to vector<2x128xf32>
    %153 = arith.truncf %152 : vector<2x128xf32> to vector<2x128xbf16>
    %154 = vector.extract_strided_slice %27 {offsets = [3, 0, 0], sizes = [1, 128, 128], strides = [1, 1, 1]} : vector<4x128x128xbf16> to vector<1x128x128xbf16>
    %155 = vector.shape_cast %154 : vector<1x128x128xbf16> to vector<128x128xbf16>
    %cst_35 = arith.constant dense<0.000000e+00> : vector<2x128xf32>
    %156 = tpu.matmul %153, %155, %cst_35 {dimension_numbers = #tpu.dot_dimension_numbers<[1], [0], [0], [1], [0, 0, 1, 1], [], []>} : vector<2x128xbf16>, vector<128x128xbf16>, vector<2x128xf32> -> vector<2x128xf32>
    %157 = arith.addf %150, %156 : vector<2x128xf32>
    %cst_36 = arith.constant dense<0.000000e+00> : vector<128xf32>
    %158 = vector.multi_reduction <add>, %157, %cst_36 [0] : vector<2x128xf32> to vector<128xf32>
    %159 = vector.shape_cast %158 : vector<128xf32> to vector<1x128xf32>
    %cst_37 = arith.constant 5.000000e-01 : f32
    %160 = vector.broadcast %cst_37 : f32 to vector<1x128xf32>
    %161 = arith.mulf %159, %160 : vector<1x128xf32>
    %162 = vector.broadcast %161 : vector<1x128xf32> to vector<2x128xf32>
    %163 = arith.subf %157, %162 : vector<2x128xf32>
    %164 = arith.mulf %163, %163 : vector<2x128xf32>
    %cst_38 = arith.constant dense<0.000000e+00> : vector<128xf32>
    %165 = vector.multi_reduction <add>, %164, %cst_38 [0] : vector<2x128xf32> to vector<128xf32>
    %166 = vector.shape_cast %165 : vector<128xf32> to vector<1x128xf32>
    %cst_39 = arith.constant 5.000000e-01 : f32
    %167 = vector.broadcast %cst_39 : f32 to vector<1x128xf32>
    %168 = arith.mulf %166, %167 : vector<1x128xf32>
    %cst_40 = arith.constant 0.000000e+00 : f32
    %169 = vector.broadcast %cst_40 : f32 to vector<1x128xf32>
    %170 = arith.maximumf %168, %169 : vector<1x128xf32>
    %cst_41 = arith.constant 9.99999974E-6 : f32
    %171 = vector.broadcast %cst_41 : f32 to vector<1x128xf32>
    %172 = arith.addf %170, %171 : vector<1x128xf32>
    %173 = math.rsqrt %172 : vector<1x128xf32>
    %174 = vector.extract_strided_slice %0 {offsets = [2, 0], sizes = [1, 128], strides = [1, 1]} : vector<8x128xf32> to vector<1x128xf32>
    %175 = arith.mulf %173, %174 : vector<1x128xf32>
    %176 = vector.broadcast %175 : vector<1x128xf32> to vector<2x128xf32>
    %177 = arith.mulf %163, %176 : vector<2x128xf32>
    %178 = vector.extract_strided_slice %0 {offsets = [3, 0], sizes = [1, 128], strides = [1, 1]} : vector<8x128xf32> to vector<1x128xf32>
    %179 = vector.broadcast %178 : vector<1x128xf32> to vector<2x128xf32>
    %180 = arith.addf %177, %179 : vector<2x128xf32>
    %cst_42 = arith.constant 0.000000e+00 : f32
    %181 = vector.broadcast %cst_42 : f32 to vector<2x128xf32>
    %182 = arith.maximumf %180, %181 : vector<2x128xf32>
    %183 = arith.truncf %182 : vector<2x128xf32> to vector<2x128xbf16>
    %cst_43 = arith.constant dense<0.000000e+00> : vector<2x128xf32>
    %184 = tpu.matmul %183, %28, %cst_43 {dimension_numbers = #tpu.dot_dimension_numbers<[1], [0], [0], [1], [0, 0, 1, 1], [], []>} : vector<2x128xbf16>, vector<128x128xbf16>, vector<2x128xf32> -> vector<2x128xf32>
    %185 = vector.extract_strided_slice %0 {offsets = [4, 0], sizes = [1, 128], strides = [1, 1]} : vector<8x128xf32> to vector<1x128xf32>
    %186 = vector.broadcast %185 : vector<1x128xf32> to vector<2x128xf32>
    %187 = arith.addf %184, %186 : vector<2x128xf32>
    %cst_44 = arith.constant 0.000000e+00 : f32
    %188 = vector.broadcast %cst_44 : f32 to vector<2x128xf32>
    %189 = arith.maximumf %187, %188 : vector<2x128xf32>
    %c0_45 = arith.constant 0 : index
    %c0_46 = arith.constant 0 : index
    %190 = vector.load %arg7[%c0_45, %c0_46] : memref<2x128xf32, #tpu.memory_space<vmem>>, vector<2x128xf32>
    tpu.vector_store %arg7[%c0_45, %c0_46], %189 {strides = array<i32>} : memref<2x128xf32, #tpu.memory_space<vmem>>, vector<2x128xf32>,
    return
  }
  func.func @transform_0(%arg0: i32) -> (i32, i32, i32) {
    %c0_i32 = arith.constant 0 : i32
    %c0_i32_0 = arith.constant 0 : i32
    %c0_i32_1 = arith.constant 0 : i32
    %c0_i32_2 = arith.constant 0 : i32
    return %c0_i32, %c0_i32_0, %c0_i32_1 : i32, i32, i32
  }
  func.func @transform_1(%arg0: i32) -> (i32, i32) {
    %c0_i32 = arith.constant 0 : i32
    %c0_i32_0 = arith.constant 0 : i32
    %c0_i32_1 = arith.constant 0 : i32
    return %c0_i32, %c0_i32_0 : i32, i32
  }
  func.func @transform_2(%arg0: i32) -> (i32, i32, i32) {
    %c0_i32 = arith.constant 0 : i32
    %c0_i32_0 = arith.constant 0 : i32
    %c0_i32_1 = arith.constant 0 : i32
    %c0_i32_2 = arith.constant 0 : i32
    return %c0_i32, %c0_i32_0, %c0_i32_1 : i32, i32, i32
  }
  func.func @transform_3(%arg0: i32) -> (i32, i32, i32) {
    %c0_i32 = arith.constant 0 : i32
    %c0_i32_0 = arith.constant 0 : i32
    %c0_i32_1 = arith.constant 0 : i32
    %c0_i32_2 = arith.constant 0 : i32
    return %c0_i32, %c0_i32_0, %c0_i32_1 : i32, i32, i32
  }
  func.func @transform_4(%arg0: i32) -> (i32, i32) {
    %c0_i32 = arith.constant 0 : i32
    %c0_i32_0 = arith.constant 0 : i32
    %c0_i32_1 = arith.constant 0 : i32
    return %c0_i32, %c0_i32_0 : i32, i32
  }
  func.func @transform_5(%arg0: i32) -> (i32, i32) {
    %c0_i32 = arith.constant 0 : i32
    %c0_i32_0 = arith.constant 0 : i32
    %c0_i32_1 = arith.constant 0 : i32
    return %c0_i32, %c0_i32_0 : i32, i32
  }
  func.func @transform_6(%arg0: i32) -> (i32, i32) {
    %c0_i32 = arith.constant 0 : i32
    %c0_i32_0 = arith.constant 0 : i32
    %c0_i32_1 = arith.constant 0 : i32
    return %c0_i32, %c0_i32_0 : i32, i32
  }
}

</mosaic_0001>

<bundles_post_ra>
// kernel: tile.8
= control target key start
LH: loop header
LB: loop body
LE: loop exit
PB: predicated region body
PF: predicated region fallthrough
CT: control target
= control target key end

     0   :  { %s28_s0 = inlined_call_operand.vmem [shape: f32[10], index: 0, kind: input, shape index: {}]   ;;  %s29_s1 = inlined_call_operand.vmem [shape: f32[12,10], index: 1, kind: output, shape index: {}]  }
   0x1   :  { %v4_v0 = vld [vmem:[%s28_s0] ss:$0 sm:$0xff] }
   0x2   :  { %5 = vst [vmem:[%s29_s1] sm:$0xff] %v4_v0  ;;  %8 = vst [vmem:[%s29_s1 + $0x8] sm:$0xff] %v4_v0 }

// kernel: _forward_fused.1
= control target key start
LH: loop header
LB: loop body
LE: loop exit
PB: predicated region body
PF: predicated region fallthrough
CT: control target
= control target key end

     0   :  { %vm60_vm0 = vcmask 1046528   ;;  %vm126_vm1 = vcmask 1044480   ;;  %vm93_vm2 = vcmask 1045504   ;;  %vm159_vm3 = vcmask 1043456   ;;  %s3212_s13 = smov 28   ;;  %s3213_s16 = smov 84   ;;  %s4290_s0 = inlined_call_operand.vmem [shape: f32[2,28,28], index: 0, kind: input, shape index: {}]   ;;  %s4291_s1 = inlined_call_operand.vmem [shape: bf16[140,256], index: 1, kind: input, shape index: {}]   ;;  %s4292_s2 = inlined_call_operand.vmem [shape: bf16[5,128,256], index: 2, kind: input, shape index: {}]   ;;  %s4293_s3 = inlined_call_operand.vmem [shape: bf16[4,128,128], index: 3, kind: input, shape index: {}]   ;;  %s4294_s4 = inlined_call_operand.vmem [shape: bf16[128,128], index: 4, kind: input, shape index: {}]   ;;  %s4295_s5 = inlined_call_operand.vmem [shape: f32[8,128], index: 5, kind: input, shape index: {}]   ;;  %s4296_s6 = inlined_call_operand.hbm [shape: f32[2,128], index: 6, kind: output, shape index: {}]  }
   0x1   :  { %v3265_v0 = vld [vmem:[%s4290_s0] sm:$0xff]  ;;  %v3270_v1 = vld [vmem:[%s4290_s0 + $0x8] sm:$0xff]  ;;  %v3275_v2 = vld [vmem:[%s4290_s0 + $0x10] sm:$0xff]  ;;  %s3214_s24 = smov 56   ;;  %s3215_s25 = smov 112  }
   0x2   :  { %v61_v3 = vrot.slane %v3265_v0, 1  ;;  %v62_v4 = vrot.slane %v3270_v1, 1  ;;  %v64_v5 = vrot.slane %v3275_v2, 1  ;;  %v127_v6 = vrot.slane %v3265_v0, 3  ;;  %v29_v14 = vld [vmem:[%s4290_s0 + $0x18] sm:$0xf] }
   0x3   :  { %v128_v7 = vrot.slane %v3270_v1, 3  ;;  %v130_v8 = vrot.slane %v3275_v2, 3  ;;  %v94_v9 = vrot.slane %v3265_v0, 2  ;;  %v95_v12 = vrot.slane %v3270_v1, 2  ;;  %v3294_v15 = vld [vmem:[%s4290_s0 + $0x20] sm:$0xff]  ;;  %v3301_v19 = vld [vmem:[%s4290_s0 + $0x28] sm:$0xff] }
   0x4   :  { %v63_v10 = vsel %vm60_vm0, %v61_v3, %v62_v4  ;;  %v65_v11 = vsel %vm60_vm0, %v62_v4, %v64_v5  ;;  %v97_v13 = vrot.slane %v3275_v2, 2  ;;  %v160_v23 = vrot.slane %v3265_v0, 4  ;;  %v2998_v24 = vld [vmem:[%s4291_s1 + $0x74] ss:$8 sps:$4 sm:$0xff]   ;;  %v3000_v25 = vld [vmem:[%s4291_s1 + $0x70] ss:$8 sps:$4 sm:$0xff]  }
   0x5   :  { %v2938_v16 = vpack.i.bf16 %v65_v11, %v63_v10  ;;  %v129_v17 = vsel %vm126_vm1, %v127_v6, %v128_v7  ;;  %v131_v18 = vsel %vm126_vm1, %v128_v7, %v130_v8  ;;  %v96_v21 = vsel %vm93_vm2, %v94_v9, %v95_v12  ;;  %v3001_v30 = vld [vmem:[%s4291_s1 + $0x64] ss:$8 sps:$4 sm:$0xff]   ;;  %v3325_v35 = vld [vmem:[%s4290_s0 + $0x30] sm:$0xff]  ;;  %v3330_v36 = vld [vmem:[%s4290_s0 + $0x38] sm:$0xf]  ;;  %330 = vmatprep.subr.bf16.mxu0 %v2998_v24 }
   0x6   :  { %v2948_v20 = vpack.i.bf16 %v131_v18, %v129_v17  ;;  %v98_v22 = vsel %vm93_vm2, %v95_v12, %v97_v13  ;;  %v161_v27 = vrot.slane %v3270_v1, 4  ;;  %v163_v28 = vrot.slane %v3275_v2, 4  ;;  %331 = vmatpush1.bf16.msra.mxu0 %v3000_v25  ;;  %v3003_v41 = vld [vmem:[%s4291_s1 + $0x60] ss:$8 sps:$4 sm:$0xff]   ;;  %v3004_v46 = vld [vmem:[%s4291_s1 + $0x54] ss:$8 sps:$4 sm:$0xff]  }
   0x7   :  { %2939 = vrot.lane.b32.xlu0 %v2938_v16, %s3212_s13  ;;  %v2943_v26 = vpack.i.bf16 %v98_v22, %v96_v21  ;;  %v66_v29 = vrot.slane %v29_v14, 1  ;;  %v68_v31 = vrot.slane %v3294_v15, 1  ;;  %v69_v32 = vrot.slane %v3301_v19, 1  ;;  %332 = vmatprep.subr.bf16.mxu0 %v3001_v30  ;;  %v3006_v59 = vld [vmem:[%s4291_s1 + $0x50] ss:$8 sps:$4 sm:$0xff]  }
   0x8   :  { %2949 = vrot.lane.b32.xlu1 %v2948_v20, %s3213_s16  ;;  %v99_v33 = vrot.slane %v29_v14, 2  ;;  %v101_v34 = vrot.slane %v3294_v15, 2  ;;  %v162_v37 = vsel %vm159_vm3, %v160_v23, %v161_v27  ;;  %v164_v38 = vsel %vm159_vm3, %v161_v27, %v163_v28  ;;  %v3007_v63 = vld [vmem:[%s4291_s1 + $0x44] ss:$8 sps:$4 sm:$0xff]   ;;  %v3010_v16 = vld [vmem:[%s4291_s1 + $0x34] ss:$8 sps:$4 sm:$0xff]  }
   0x9   :  { %v67_v39 = vsel %vm60_vm0, %v64_v5, %v66_v29  ;;  %v102_v40 = vrot.slane %v3301_v19, 2  ;;  %v2953_v42 = vpack.i.bf16 %v164_v38, %v162_v37  ;;  %v70_v43 = vsel %vm60_vm0, %v68_v31, %v69_v32  ;;  %v3012_v18 = vld [vmem:[%s4291_s1 + $0x30] ss:$8 sps:$4 sm:$0xff]   ;;  %v3013_v23 = vld [vmem:[%s4291_s1 + $0x24] ss:$8 sps:$4 sm:$0xff]  }
   0xa   :  { %v100_v44 = vsel %vm93_vm2, %v97_v13, %v99_v33  ;;  %v132_v45 = vrot.slane %v29_v14, 3  ;;  %v2958_v47 = vpack.i.bf16 %v70_v43, %v67_v39  ;;  %v134_v49 = vrot.slane %v3294_v15, 3  ;;  %333 = vmatpush1.bf16.msra.mxu0 %v3003_v41  ;;  %v3009_v13 = vld [vmem:[%s4291_s1 + $0x40] ss:$8 sps:$4 sm:$0xff]   ;;  %v3016_v29 = vld [vmem:[%s4291_s1 + $0x14] ss:$8 sps:$4 sm:$0xff]  }
   0xb   :  { %2944 = vrot.lane.b32.xlu0 %v2943_v26, %s3214_s24  ;;  %v103_v48 = vsel %vm93_vm2, %v101_v34, %v102_v40  ;;  %v135_v50 = vrot.slane %v3301_v19, 3  ;;  %v165_v53 = vrot.slane %v29_v14, 4  ;;  %v167_v54 = vrot.slane %v3294_v15, 4  ;;  %334 = vmatprep.subr.bf16.mxu0 %v3004_v46  ;;  %v3015_v27 = vld [vmem:[%s4291_s1 + $0x20] ss:$8 sps:$4 sm:$0xff]  }
   0xc   :  { %2954 = vrot.lane.b32.xlu1 %v2953_v42, %s3215_s25  ;;  %v2963_v51 = vpack.i.bf16 %v103_v48, %v100_v44  ;;  %v133_v52 = vsel %vm126_vm1, %v130_v8, %v132_v45  ;;  %v168_v56 = vrot.slane %v3301_v19, 4  ;;  %v71_v57 = vrot.slane %v3325_v35, 1  ;;  %v3018_v30 = vld [vmem:[%s4291_s1 + $0x10] ss:$8 sps:$4 sm:$0xff]   ;;  %v3019_v31 = vld [vmem:[%s4291_s1 + $0x4] ss:$8 sps:$4 sm:$0xff]  }
   0xd   :  { %v136_v55 = vsel %vm126_vm1, %v134_v49, %v135_v50  ;;  %v73_v58 = vrot.slane %v3330_v36, 1  ;;  %v166_v60 = vsel %vm159_vm3, %v163_v28, %v165_v53  ;;  %v104_v61 = vrot.slane %v3325_v35, 2  ;;  %v3022_v33 = vld [vmem:[%s4291_s1 + $0x84] ss:$8 sps:$4 sm:$0x3f]  }
   0xe   :  { %v106_v62 = vrot.slane %v3330_v36, 2  ;;  %v2968_v3 = vpack.i.bf16 %v136_v55, %v133_v52  ;;  %v169_v4 = vsel %vm159_vm3, %v167_v54, %v168_v56  ;;  %v72_v6 = vsel %vm60_vm0, %v69_v32, %v71_v57  ;;  %335 = vmatpush1.bf16.msra.mxu0 %v3006_v59  ;;  %v3021_v32 = vld [vmem:[%s4291_s1] ss:$8 sps:$4 sm:$0xff]  }
   0xf   :  { %2959 = vrot.lane.b32.xlu0 %v2958_v47, %s3212_s13  ;;  %v2973_v5 = vpack.i.bf16 %v169_v4, %v166_v60  ;;  %v74_v7 = vsel %vm60_vm0, %v71_v57, %v73_v58  ;;  %v137_v8 = vrot.slane %v3325_v35, 3  ;;  %v105_v9 = vsel %vm93_vm2, %v102_v40, %v104_v61  ;;  %336 = vmatprep.subr.bf16.mxu0 %v3007_v63  ;;  %v3024_v34 = vld [vmem:[%s4291_s1 + $0x80] ss:$8 sps:$4 sm:$0x3f]  }
  0x10   :  { %2964 = vrot.lane.b32.xlu1 %v2963_v51, %s3214_s24  ;;  %v107_v10 = vsel %vm93_vm2, %v104_v61, %v106_v62  ;;  %v139_v11 = vrot.slane %v3330_v36, 3  ;;  %v170_v12 = vrot.slane %v3325_v35, 4  ;;  %v172_v14 = vrot.slane %v3330_v36, 4 }
  0x11   :  { %v2978_v17 = vpack.i.bf16 %v74_v7, %v72_v6  ;;  %v2983_v20 = vpack.i.bf16 %v107_v10, %v105_v9  ;;  %v138_v21 = vsel %vm126_vm1, %v135_v50, %v137_v8  ;;  %v325_v36 = vsel %vm93_vm2, %v3024_v34, 0 }
  0x12   :  { %v140_v22 = vsel %vm126_vm1, %v137_v8, %v139_v11  ;;  %v171_v24 = vsel %vm159_vm3, %v168_v56, %v170_v12  ;;  %v173_v25 = vsel %vm159_vm3, %v170_v12, %v172_v14  ;;  %337 = vmatpush1.bf16.msra.mxu0 %v3009_v13 }
  0x13   :  { %2969 = vrot.lane.b32.xlu0 %v2968_v3, %s3213_s16  ;;  %338 = vmatprep.subr.bf16.mxu0 %v3010_v16  ;;  %v2988_v26 = vpack.i.bf16 %v140_v22, %v138_v21  ;;  %v2993_v28 = vpack.i.bf16 %v173_v25, %v171_v24 }
  0x14   :  { %2974 = vrot.lane.b32.xlu1 %v2973_v5, %s3215_s25 }
  0x16   :  { %339 = vmatpush1.bf16.msra.mxu0 %v3012_v18 }
  0x17   :  { %2979 = vrot.lane.b32.xlu0 %v2978_v17, %s3212_s13  ;;  %340 = vmatprep.subr.bf16.mxu0 %v3013_v23 }
  0x18   :  { %2984 = vrot.lane.b32.xlu1 %v2983_v20, %s3214_s24 }
  0x1a   :  { %341 = vmatpush1.bf16.msra.mxu0 %v3015_v27 }
  0x1b   :  { %2989 = vrot.lane.b32.xlu0 %v2988_v26, %s3213_s16  ;;  %342 = vmatprep.subr.bf16.mxu0 %v3016_v29 }
  0x1c   :  { %2994 = vrot.lane.b32.xlu1 %v2993_v28, %s3215_s25 }
  0x1e   :  { %343 = vmatpush1.bf16.msra.mxu0 %v3018_v30 }
  0x1f   :  { %344 = vmatprep.subr.bf16.mxu0 %v3019_v31 }
  0x22   :  { %345 = vmatpush1.bf16.msra.mxu0 %v3021_v32 }
  0x23   :  { %2654 = vmatprep.subr.msk.bf16.mxu0 %vm93_vm2, %v3022_v33 }
  0x26   :  { %361 = vmatpush2.bf16.msra.mxu0 %v325_v36 }
  0x27   :  { %11 = vsyncpa [#allocation3], 0  ;;  %vm192_vm4 = vcmask 228352   ;;  %vm199_vm5 = vcmask 457728   ;;  %vm206_vm6 = vcmask 687104   ;;  %vm213_vm7 = vcmask 916480  }
  0x28   :  { %vm314_vm8 = vcmask 97280   ;;  %vm531_vm9 = vcmask 1041408   ;;  %vm1011_vm15 = vcmask 1041409   ;;  %s3219_s8 = smov 108   ;;  %s3220_s9 = smov 68  }
  0x29   :  { %s3221_s10 = smov 40   ;;  %s3222_s11 = smov 20  }
  0x2a   :  { %s3223_s12 = smov 60  }
  0x79   :  { %v2940_v37 = vpop.permute.xlu0 %2939 }
  0x7a   :  { %v2950_v38 = vpop.permute.xlu1 %2949  ;;  %v2942_v39 = vunpack.i.h.bf16 %v2940_v37  ;;  %v2941_v40 = vunpack.i.l.bf16 %v2940_v37 }
  0x7b   :  { %v2952_v42 = vunpack.i.h.bf16 %v2950_v38  ;;  %v2951_v43 = vunpack.i.l.bf16 %v2950_v38 }
  0x7c   :  { %v194_v47 = vsel %vm192_vm4, %v3270_v1, %v2942_v39  ;;  %v193_v48 = vsel %vm192_vm4, %v3265_v0, %v2941_v40  ;;  %v3025_v39 = vld [vmem:[%s4292_s2 + $0xf4] ss:$8 sps:$4 sm:$0xff]   ;;  %v3027_v40 = vld [vmem:[%s4292_s2 + $0xf0] ss:$8 sps:$4 sm:$0xff]  }
  0x7d   :  { %v2945_v41 = vpop.permute.xlu0 %2944  ;;  %1127 = vmatprep.subr.bf16.mxu1 %v3025_v39 }
  0x7e   :  { %v2947_v44 = vunpack.i.h.bf16 %v2945_v41  ;;  %v2946_v45 = vunpack.i.l.bf16 %v2945_v41  ;;  %v2955_v46 = vpop.permute.xlu1 %2954  ;;  %v3030_v41 = vld [vmem:[%s4292_s2 + $0x174] ss:$8 sps:$4 sm:$0xff]   ;;  %1128 = vmatpush1.bf16.msra.mxu1 %v3027_v40 }
  0x7f   :  { %v2957_v49 = vunpack.i.h.bf16 %v2955_v46  ;;  %v2956_v50 = vunpack.i.l.bf16 %v2955_v46  ;;  %1443 = vmatprep.subr.bf16.mxu0 %v3030_v41  ;;  %v3034_v46 = vld [vmem:[%s4292_s2 + $0x160] ss:$8 sps:$4 sm:$0xff]  }
  0x80   :  { %v200_v51 = vsel %vm199_vm5, %v193_v48, %v2946_v45  ;;  %v201_v52 = vsel %vm199_vm5, %v194_v47, %v2947_v44  ;;  %v3033_v44 = vld [vmem:[%s4292_s2 + $0xe0] ss:$8 sps:$4 sm:$0xff]   ;;  %v3036_v45 = vld [vmem:[%s4292_s2 + $0x164] ss:$8 sps:$4 sm:$0xff]   ;;  %v3037_v47 = vld [vmem:[%s4292_s2 + $0xd4] ss:$8 sps:$4 sm:$0xff]  }
  0x81   :  { %v2960_v53 = vpop.permute.xlu0 %2959  ;;  %v221_v54 = vpack.c.bf16 %v2957_v49, %v2956_v50  ;;  %v207_v55 = vsel %vm206_vm6, %v200_v51, %v2951_v43  ;;  %v208_v56 = vsel %vm206_vm6, %v201_v52, %v2952_v42  ;;  %v3028_v42 = vld [vmem:[%s4292_s2 + $0x170] ss:$8 sps:$4 sm:$0xff]   ;;  %v3031_v43 = vld [vmem:[%s4292_s2 + $0xe4] ss:$8 sps:$4 sm:$0xff]   ;;  %v3045_v52 = vld [vmem:[%s4292_s2 + $0xc0] ss:$8 sps:$4 sm:$0xff]  }
  0x82   :  { %v2962_v57 = vunpack.i.h.bf16 %v2960_v53  ;;  %v2961_v58 = vunpack.i.l.bf16 %v2960_v53  ;;  %v2965_v59 = vpop.permute.xlu1 %2964  ;;  %v214_v1 = vsel %vm213_vm7, %v207_v55, %v2956_v50  ;;  %v215_v0 = vsel %vm213_vm7, %v208_v56, %v2957_v49  ;;  %1129 = vmatprep.subr.bf16.mxu1 %v3031_v43  ;;  %v3039_v48 = vld [vmem:[%s4292_s2 + $0xd0] ss:$8 sps:$4 sm:$0xff]   ;;  %v3042_v49 = vld [vmem:[%s4292_s2 + $0x154] ss:$8 sps:$4 sm:$0xff]   ;;  %v3043_v51 = vld [vmem:[%s4292_s2 + $0xc4] ss:$8 sps:$4 sm:$0xff]  }
  0x83   :  { %v2967_v60 = vunpack.i.h.bf16 %v2965_v59  ;;  %v2966_v61 = vunpack.i.l.bf16 %v2965_v59  ;;  %2655 = vmatprep.mubr.msk.bf16.mxu0 %vm314_vm8, %v221_v54  ;;  %v220_v62 = vpack.c.bf16 %v215_v0, %v214_v1  ;;  %1130 = vmatpush1.bf16.msra.mxu1 %v3033_v44  ;;  %v3040_v50 = vld [vmem:[%s4292_s2 + $0x150] ss:$8 sps:$4 sm:$0xff]   ;;  %v3048_v53 = vld [vmem:[%s4292_s2 + $0x144] ss:$8 sps:$4 sm:$0xff]   ;;  %v3046_v54 = vld [vmem:[%s4292_s2 + $0x140] ss:$8 sps:$4 sm:$0xff]  }
  0x84   :  { %v196_v63 = vsel %vm192_vm4, %v3294_v15, %v2962_v57  ;;  %v195_v3 = vsel %vm192_vm4, %v3275_v2, %v2961_v58  ;;  %1131 = vmatprep.subr.bf16.mxu1 %v3037_v47  ;;  %v3049_v55 = vld [vmem:[%s4292_s2 + $0xb4] ss:$8 sps:$4 sm:$0xff]   ;;  %v3051_v56 = vld [vmem:[%s4292_s2 + $0xb0] ss:$8 sps:$4 sm:$0xff]   ;;  %v3055_v59 = vld [vmem:[%s4292_s2 + $0xa4] ss:$8 sps:$4 sm:$0xff]  }
  0x85   :  { %v202_v4 = vsel %vm199_vm5, %v195_v3, %v2966_v61  ;;  %v203_v5 = vsel %vm199_vm5, %v196_v63, %v2967_v60  ;;  %v2970_v6 = vpop.permute.xlu0 %2969  ;;  %363 = vmatmul.mubr.bf16.vlgmr.msra.gmra.mxu0 %v220_v62  ;;  %v3054_v57 = vld [vmem:[%s4292_s2 + $0x134] ss:$8 sps:$4 sm:$0xff]   ;;  %v3052_v58 = vld [vmem:[%s4292_s2 + $0x130] ss:$8 sps:$4 sm:$0xff]   ;;  %v3057_v1 = vld [vmem:[%s4292_s2 + $0xa0] ss:$8 sps:$4 sm:$0xff]  }
  0x86   :  { %v2972_v7 = vunpack.i.h.bf16 %v2970_v6  ;;  %v2971_v8 = vunpack.i.l.bf16 %v2970_v6  ;;  %v2975_v9 = vpop.permute.xlu1 %2974  ;;  %1444 = vmatpush1.bf16.msra.mxu0 %v3028_v42  ;;  %v3060_v0 = vld [vmem:[%s4292_s2 + $0x124] ss:$8 sps:$4 sm:$0xff]   ;;  %v3058_v60 = vld [vmem:[%s4292_s2 + $0x120] ss:$8 sps:$4 sm:$0xff]   ;;  %v3061_v61 = vld [vmem:[%s4292_s2 + $0x94] ss:$8 sps:$4 sm:$0xff]  }
  0x87   :  { %v2977_v10 = vunpack.i.h.bf16 %v2975_v9  ;;  %v2976_v11 = vunpack.i.l.bf16 %v2975_v9  ;;  %1445 = vmatprep.subr.bf16.mxu0 %v3036_v45  ;;  %1132 = vmatpush1.bf16.msra.mxu1 %v3039_v48  ;;  %v3063_v62 = vld [vmem:[%s4292_s2 + $0x90] ss:$8 sps:$4 sm:$0xff]   ;;  %v3066_v63 = vld [vmem:[%s4292_s2 + $0x114] ss:$8 sps:$4 sm:$0xff]   ;;  %v3070_v6 = vld [vmem:[%s4292_s2 + $0x100] ss:$8 sps:$4 sm:$0xff]  }
  0x88   :  { %v209_v12 = vsel %vm206_vm6, %v202_v4, %v2971_v8  ;;  %v210_v13 = vsel %vm206_vm6, %v203_v5, %v2972_v7  ;;  %1133 = vmatprep.subr.bf16.mxu1 %v3043_v51  ;;  %v3064_v3 = vld [vmem:[%s4292_s2 + $0x110] ss:$8 sps:$4 sm:$0xff]   ;;  %v3067_v4 = vld [vmem:[%s4292_s2 + $0x84] ss:$8 sps:$4 sm:$0xff]   ;;  %v3069_v5 = vld [vmem:[%s4292_s2 + $0x80] ss:$8 sps:$4 sm:$0xff]  }
  0x89   :  { %v223_v14 = vpack.c.bf16 %v2977_v10, %v2976_v11  ;;  %v2980_v15 = vpop.permute.xlu0 %2979  ;;  %v216_v16 = vsel %vm213_vm7, %v209_v12, %v2976_v11  ;;  %v217_v2 = vsel %vm213_vm7, %v210_v13, %v2977_v10  ;;  %v3072_v7 = vld [vmem:[%s4292_s2 + $0x104] ss:$8 sps:$4 sm:$0xff]   ;;  %v3216_v8 = vmov 0   ;;  %v3075_v9 = vld [vmem:[%s4292_s2 + $0x74] ss:$8 sps:$4 sm:$0xff]  }
  0x8a   :  { %v2982_v17 = vunpack.i.h.bf16 %v2980_v15  ;;  %v2981_v18 = vunpack.i.l.bf16 %v2980_v15  ;;  %v2985_v20 = vpop.permute.xlu1 %2984  ;;  %v222_v21 = vpack.c.bf16 %v217_v2, %v216_v16  ;;  %1446 = vmatpush1.bf16.msra.mxu0 %v3034_v46  ;;  %1159 = vmatprep.mubr.bf16.mxu1 %v3216_v8  ;;  %v3078_v10 = vld [vmem:[%s4292_s2 + $0x274] ss:$8 sps:$4 sm:$0xff]   ;;  %v3217_v11 = vmov 1983009808  }
  0x8b   :  { %v2987_v22 = vunpack.i.h.bf16 %v2985_v20  ;;  %v2986_v23 = vunpack.i.l.bf16 %v2985_v20  ;;  %2656 = vmatprep.mubr.msk.bf16.mxu0 %vm314_vm8, %v223_v14  ;;  %1447 = vmatprep.subr.bf16.mxu0 %v3042_v49  ;;  %v407_v12 = vunpack.c.l.s4 %v3217_v11  ;;  %v409_v13 = vlaneseq }
  0x8c   :  { %v198_v24 = vsel %vm192_vm4, %v3325_v35, %v2982_v17  ;;  %v197_v25 = vsel %vm192_vm4, %v3301_v19, %v2981_v18  ;;  %1134 = vmatpush1.bf16.msra.mxu1 %v3045_v52 }
  0x8d   :  { %v204_v26 = vsel %vm199_vm5, %v197_v25, %v2986_v23  ;;  %v205_v27 = vsel %vm199_vm5, %v198_v24, %v2987_v22  ;;  %v2990_v28 = vpop.permute.xlu0 %2989  ;;  %373 = vmatmul.mubr.bf16.gmra.mxu0 %v222_v21  ;;  %1135 = vmatprep.subr.bf16.mxu1 %v3049_v55  ;;  %v408_v14 = vunpack.c.0.s8 %v407_v12  ;;  %v3557_v15 = vshrl.u32 %v409_v13, 7 }
  0x8e   :  { %v2992_v29 = vunpack.i.h.bf16 %v2990_v28  ;;  %v2991_v30 = vunpack.i.l.bf16 %v2990_v28  ;;  %v2995_v31 = vpop.permute.xlu1 %2994  ;;  %1448 = vmatpush1.bf16.msra.mxu0 %v3040_v50 }
  0x8f   :  { %v2997_v32 = vunpack.i.h.bf16 %v2995_v31  ;;  %v2996_v33 = vunpack.i.l.bf16 %v2995_v31  ;;  %1449 = vmatprep.subr.bf16.mxu0 %v3048_v53  ;;  %v3560_v2 = vsub.s32 %v408_v14, %v3557_v15  ;;  %v702_v23 = vsub.s32 5, %v3557_v15 }
  0x90   :  { %v211_v34 = vsel %vm206_vm6, %v204_v26, %v2991_v30  ;;  %v212_v36 = vsel %vm206_vm6, %v205_v27, %v2992_v29  ;;  %1136 = vmatpush1.bf16.msra.mxu1 %v3051_v56  ;;  %v25_v29 = vld [vmem:[%s4295_s5] sm:$0xff] }
  0x91   :  { %v225_v37 = vpack.c.bf16 %v2997_v32, %v2996_v33  ;;  %v218_v35 = vsel %vm213_vm7, %v211_v34, %v2996_v33  ;;  %v219_v19 = vsel %vm213_vm7, %v212_v36, %v2997_v32  ;;  %1137 = vmatprep.subr.bf16.mxu1 %v3055_v59  ;;  %v3573_v39 = vrot.slane %v25_v29, %v702_v23 }
  0x92   :  { %v224_v38 = vpack.c.bf16 %v219_v19, %v218_v35  ;;  %1450 = vmatpush1.bf16.msra.mxu0 %v3046_v54 }
  0x93   :  { %2657 = vmatprep.mubr.msk.bf16.mxu0 %vm314_vm8, %v225_v37  ;;  %1451 = vmatprep.subr.bf16.mxu0 %v3054_v57 }
  0x94   :  { %1138 = vmatpush1.bf16.msra.mxu1 %v3057_v1 }
  0x95   :  { %383 = vmatmul.mubr.bf16.gmra.mxu0 %v224_v38  ;;  %1139 = vmatprep.subr.bf16.mxu1 %v3061_v61 }
  0x96   :  { %1452 = vmatpush1.bf16.msra.mxu0 %v3052_v58  ;;  %1475 = vmatprep.mubr.bf16.mxu0 %v3216_v8 }
  0x97   :  { %1453 = vmatprep.subr.bf16.mxu0 %v3060_v0 }
  0x98   :  { %1140 = vmatpush1.bf16.msra.mxu1 %v3063_v62 }
  0x99   :  { %1141 = vmatprep.subr.bf16.mxu1 %v3067_v4 }
  0x9a   :  { %1454 = vmatpush1.bf16.msra.mxu0 %v3058_v60 }
  0x9b   :  { %1455 = vmatprep.subr.bf16.mxu0 %v3066_v63 }
  0x9c   :  { %1142 = vmatpush1.bf16.msra.mxu1 %v3069_v5 }
  0x9d   :  { %1284 = vmatprep.subr.bf16.mxu1 %v3075_v9 }
  0x9e   :  { %1456 = vmatpush1.bf16.msra.mxu0 %v3064_v3 }
  0x9f   :  { %1457 = vmatprep.subr.bf16.mxu0 %v3072_v7 }
  0xa2   :  { %1458 = vmatpush1.bf16.msra.mxu0 %v3070_v6 }
  0xa3   :  { %1769 = vmatprep.subr.bf16.mxu0 %v3078_v10 }
 0x145   :  { %v364_v16 = vpop.f32.mrf.mxu0 }
 0x147   :  { %v366_v17 = vpop.f32.mrf.mxu0 }
 0x148   :  { %v393_v18 = vmax.f32 %v364_v16, %v366_v17 }
 0x149   :  { %v368_v20 = vpop.f32.mrf.mxu0 }
 0x14a   :  { %v405_v21 = vcombine.high %v393_v18, %v393_v18  ;;  %v412_v22 = vrot.slane %v393_v18, %v3560_v2 }
 0x14b   :  { %v370_v24 = vpop.f32.mrf.mxu0 }
 0x14c   :  { %v419_v25 = vrot.slane %v405_v21, %v3560_v2  ;;  %v420_v26 = vcombine.high %v412_v22, %v412_v22  ;;  %v532_v27 = vsel %vm531_vm9, %v412_v22, -inf  ;;  %v394_v28 = vmax.f32 %v368_v20, %v370_v24 }
 0x14d   :  { %v533_v30 = vrot.slane %v532_v27, 4  ;;  %v374_v57 = vpop.f32.mrf.mxu0 }
 0x14e   :  { %v421_v31 = vcombine.high %v419_v25, %v419_v25  ;;  %v539_v32 = vsel %vm531_vm9, %v420_v26, -inf  ;;  %v546_v33 = vsel %vm531_vm9, %v419_v25, -inf  ;;  %v422_v34 = vcombine.high %v394_v28, %v394_v28 }
 0x14f   :  { %v534_v36 = vmax.f32 %v532_v27, %v533_v30  ;;  %v540_v37 = vrot.slane %v539_v32, 4  ;;  %v547_v35 = vrot.slane %v546_v33, 4  ;;  %v429_v19 = vrot.slane %v394_v28, %v3560_v2  ;;  %v376_v12 = vpop.f32.mrf.mxu0 }
 0x150   :  { %v553_v38 = vsel %vm531_vm9, %v421_v31, -inf  ;;  %v436_v40 = vrot.slane %v422_v34, %v3560_v2  ;;  %v395_v25 = vmax.f32 %v374_v57, %v376_v12 }
 0x151   :  { %v535_v41 = vrot.slane %v534_v36, 2  ;;  %v541_v42 = vmax.f32 %v539_v32, %v540_v37  ;;  %v548_v43 = vmax.f32 %v546_v33, %v547_v35  ;;  %v554_v44 = vrot.slane %v553_v38, 4 }
 0x152   :  { %v437_v45 = vcombine.high %v429_v19, %v429_v19  ;;  %v438_v46 = vcombine.high %v436_v40, %v436_v40  ;;  %v560_v47 = vsel %vm531_vm9, %v429_v19, -inf  ;;  %v574_v48 = vsel %vm531_vm9, %v436_v40, -inf }
 0x153   :  { %v536_v49 = vmax.f32 %v534_v36, %v535_v41  ;;  %v542_v50 = vrot.slane %v541_v42, 2  ;;  %v549_v51 = vrot.slane %v548_v43, 2  ;;  %v555_v52 = vmax.f32 %v553_v38, %v554_v44 }
 0x154   :  { %v561_v53 = vrot.slane %v560_v47, 4  ;;  %v567_v54 = vsel %vm531_vm9, %v437_v45, -inf  ;;  %v575_v55 = vrot.slane %v574_v48, 4  ;;  %v581_v56 = vsel %vm531_vm9, %v438_v46, -inf }
 0x155   :  { %v537_v58 = vrot.slane %v536_v49, 1  ;;  %v543_v59 = vmax.f32 %v541_v42, %v542_v50  ;;  %v550_v1 = vmax.f32 %v548_v43, %v549_v51  ;;  %v556_v0 = vrot.slane %v555_v52, 2  ;;  %v378_v51 = vpop.f32.mrf.mxu0 }
 0x156   :  { %v562_v60 = vmax.f32 %v560_v47, %v561_v53  ;;  %v568_v61 = vrot.slane %v567_v54, 4  ;;  %v576_v62 = vmax.f32 %v574_v48, %v575_v55  ;;  %v582_v63 = vrot.slane %v581_v56, 4 }
 0x157   :  { %v538_v3 = vmax.f32 %v536_v49, %v537_v58  ;;  %v544_v4 = vrot.slane %v543_v59, 1  ;;  %v551_v5 = vrot.slane %v550_v1, 1  ;;  %v557_v6 = vmax.f32 %v555_v52, %v556_v0 }
 0x158   :  { %v563_v7 = vrot.slane %v562_v60, 2  ;;  %v569_v9 = vmax.f32 %v567_v54, %v568_v61  ;;  %v577_v10 = vrot.slane %v576_v62, 2  ;;  %v583_v11 = vmax.f32 %v581_v56, %v582_v63 }
 0x159   :  { %v545_v13 = vmax.f32 %v543_v59, %v544_v4  ;;  %v552_v14 = vmax.f32 %v550_v1, %v551_v5  ;;  %v558_v16 = vrot.slane %v557_v6, 1  ;;  %v704_v17 = vadd.f32 %v3573_v39, %v538_v3 }
 0x15a   :  { %v564_v18 = vmax.f32 %v562_v60, %v563_v7  ;;  %v570_v20 = vrot.slane %v569_v9, 2  ;;  %v578_v21 = vmax.f32 %v576_v62, %v577_v10  ;;  %v584_v29 = vrot.slane %v583_v11, 2  ;;  %v380_v60 = vpop.f32.mrf.mxu0 }
 0x15b   :  { %v559_v22 = vmax.f32 %v557_v6, %v558_v16  ;;  %v705_v23 = vadd.f32 %v3573_v39, %v545_v13  ;;  %v706_v24 = vadd.f32 %v3573_v39, %v552_v14  ;;  %vm728_vm10 = vcmp.ge.f32.partialorder %v704_v17, 0.0 }
 0x15c   :  { %v565_v26 = vrot.slane %v564_v18, 1  ;;  %v571_v27 = vmax.f32 %v569_v9, %v570_v20  ;;  %v579_v28 = vrot.slane %v578_v21, 1  ;;  %v752_v32 = vmul.f32 0.01, %v704_v17 }
 0x15d   :  { %v707_v30 = vadd.f32 %v3573_v39, %v559_v22  ;;  %vm729_vm11 = vcmp.ge.f32.partialorder %v705_v23, 0.0  ;;  %v753_v31 = vmul.f32 0.01, %v705_v23  ;;  %v754_v33 = vmul.f32 0.01, %v706_v24 }
 0x15e   :  { %v566_v34 = vmax.f32 %v564_v18, %v565_v26  ;;  %v572_v36 = vrot.slane %v571_v27, 1  ;;  %vm730_vm12 = vcmp.ge.f32.partialorder %v706_v24, 0.0  ;;  %v580_v38 = vmax.f32 %v578_v21, %v579_v28  ;;  %v384_v18 = vpop.f32.mrf.mxu0 }
 0x15f   :  { %vm731_vm13 = vcmp.ge.f32.partialorder %v707_v30, 0.0  ;;  %v755_v37 = vmul.f32 0.01, %v707_v30  ;;  %v777_v35 = vsel %vm729_vm11, %v705_v23, %v753_v31  ;;  %v585_v42 = vmax.f32 %v583_v11, %v584_v29 }
 0x160   :  { %v573_v19 = vmax.f32 %v571_v27, %v572_v36  ;;  %v961_v41 = vpack.c.bf16 %v777_v35, %v777_v35  ;;  %v776_v43 = vsel %vm728_vm10, %v704_v17, %v752_v32  ;;  %v778_v44 = vsel %vm730_vm12, %v706_v24, %v754_v33  ;;  %v386_v36 = vpop.f32.mrf.mxu0 }
 0x161   :  { %v779_v40 = vsel %vm731_vm13, %v707_v30, %v755_v37  ;;  %v708_v46 = vadd.f32 %v3573_v39, %v566_v34  ;;  %v586_v47 = vrot.slane %v585_v42, 1  ;;  %v710_v49 = vadd.f32 %v3573_v39, %v580_v38 }
 0x162   :  { %v963_v45 = vpack.c.bf16 %v779_v40, %v779_v40  ;;  %v709_v48 = vadd.f32 %v3573_v39, %v573_v19  ;;  %v439_v50 = vcombine.high %v395_v25, %v395_v25  ;;  %v960_v52 = vpack.c.bf16 %v776_v43, %v776_v43 }
 0x163   :  { %v962_v53 = vpack.c.bf16 %v778_v44, %v778_v44  ;;  %v3588_v54 = vunpack.c.l.b16 %v961_v41  ;;  %v756_v55 = vmul.f32 0.01, %v708_v46  ;;  %v587_v57 = vmax.f32 %v585_v42, %v586_v47 }
 0x164   :  { %v3590_v56 = vunpack.c.l.b16 %v963_v45  ;;  %vm732_vm14 = vcmp.ge.f32.partialorder %v708_v46, 0.0  ;;  %v757_v58 = vmul.f32 0.01, %v709_v48  ;;  %v758_v59 = vmul.f32 0.01, %v710_v49 }
 0x165   :  { %v446_v1 = vrot.slane %v395_v25, %v3560_v2  ;;  %v453_v0 = vrot.slane %v439_v50, %v3560_v2  ;;  %vm733_vm0 = vcmp.ge.f32.partialorder %v709_v48, 0.0  ;;  %vm734_vm1 = vcmp.ge.f32.partialorder %v710_v49, 0.0 }
 0x166   :  { %v3594_v61 = vunpack.c.l.b16 %v962_v53  ;;  %v3596_v62 = vunpack.c.l.b16 %v960_v52  ;;  %v1174_v63 = vrot.slane %v3588_v54, 7  ;;  %v780_v3 = vsel %vm732_vm14, %v708_v46, %v756_v55  ;;  %v388_v52 = vpop.f32.mrf.mxu0 }
 0x167   :  { %v711_v4 = vadd.f32 %v3573_v39, %v587_v57  ;;  %v454_v5 = vcombine.high %v446_v1, %v446_v1  ;;  %v455_v6 = vcombine.high %v453_v0, %v453_v0  ;;  %v588_v7 = vsel %vm531_vm9, %v446_v1, -inf }
 0x168   :  { %v1333_v9 = vrot.slane %v3590_v56, 7  ;;  %v781_v10 = vsel %vm733_vm0, %v709_v48, %v757_v58  ;;  %v782_v11 = vsel %vm734_vm1, %v710_v49, %v758_v59  ;;  %v589_v12 = vrot.slane %v588_v7, 4 }
 0x169   :  { %v964_v13 = vpack.c.bf16 %v780_v3, %v780_v3  ;;  %v595_v14 = vsel %vm531_vm9, %v454_v5, -inf  ;;  %v602_v16 = vsel %vm531_vm9, %v453_v0, -inf  ;;  %v609_v17 = vsel %vm531_vm9, %v455_v6, -inf }
 0x16a   :  { %v590_v20 = vmax.f32 %v588_v7, %v589_v12  ;;  %v596_v21 = vrot.slane %v595_v14, 4  ;;  %v603_v22 = vrot.slane %v602_v16, 4  ;;  %v610_v23 = vrot.slane %v609_v17, 4  ;;  %v390_v12 = vpop.f32.mrf.mxu0 }
 0x16b   :  { %v1176_v24 = vrot.slane %v3594_v61, 6  ;;  %vm735_vm2 = vcmp.ge.f32.partialorder %v711_v4, 0.0  ;;  %v759_v25 = vmul.f32 0.01, %v711_v4  ;;  %v396_v26 = vmax.f32 %v378_v51, %v380_v60 }
 0x16c   :  { %v965_v27 = vpack.c.bf16 %v781_v10, %v781_v10  ;;  %v591_v28 = vrot.slane %v590_v20, 2  ;;  %v597_v29 = vmax.f32 %v595_v14, %v596_v21  ;;  %v604_v30 = vmax.f32 %v602_v16, %v603_v22 }
 0x16d   :  { %v3608_v31 = vsel %vm1011_vm15, %v1333_v9, %v3594_v61  ;;  %v966_v32 = vpack.c.bf16 %v782_v11, %v782_v11  ;;  %v456_v33 = vcombine.high %v396_v26, %v396_v26  ;;  %v463_v34 = vrot.slane %v396_v26, %v3560_v2 }
 0x16e   :  { %v3611_v37 = vunpack.c.l.b16 %v964_v13  ;;  %v592_v35 = vmax.f32 %v590_v20, %v591_v28  ;;  %v598_v19 = vrot.slane %v597_v29, 2  ;;  %v611_v38 = vmax.f32 %v609_v17, %v610_v23 }
 0x16f   :  { %v783_v40 = vsel %vm735_vm2, %v711_v4, %v759_v25  ;;  %v470_v41 = vrot.slane %v456_v33, %v3560_v2  ;;  %v471_v42 = vcombine.high %v463_v34, %v463_v34  ;;  %v616_v43 = vsel %vm531_vm9, %v463_v34, -inf }
 0x170   :  { %v3616_v44 = vunpack.c.l.b16 %v965_v27  ;;  %v593_v45 = vrot.slane %v592_v35, 1  ;;  %v599_v46 = vmax.f32 %v597_v29, %v598_v19  ;;  %v605_v47 = vrot.slane %v604_v30, 2 }
 0x171   :  { %v472_v48 = vcombine.high %v470_v41, %v470_v41  ;;  %v617_v49 = vrot.slane %v616_v43, 4  ;;  %v623_v50 = vsel %vm531_vm9, %v471_v42, -inf  ;;  %v630_v51 = vsel %vm531_vm9, %v470_v41, -inf }
 0x172   :  { %v594_v53 = vmax.f32 %v592_v35, %v593_v45  ;;  %v600_v55 = vrot.slane %v599_v46, 1  ;;  %v612_v57 = vrot.slane %v611_v38, 2  ;;  %v397_v58 = vmax.f32 %v384_v18, %v386_v36 }
 0x173   :  { %v618_v59 = vmax.f32 %v616_v43, %v617_v49  ;;  %v624_v1 = vrot.slane %v623_v50, 4  ;;  %v631_v0 = vrot.slane %v630_v51, 4  ;;  %v637_v60 = vsel %vm531_vm9, %v472_v48, -inf }
 0x174   :  { %v967_v3 = vpack.c.bf16 %v783_v40, %v783_v40  ;;  %v601_v4 = vmax.f32 %v599_v46, %v600_v55  ;;  %v606_v5 = vmax.f32 %v604_v30, %v605_v47  ;;  %v712_v6 = vadd.f32 %v3573_v39, %v594_v53 }
 0x175   :  { %v3622_v7 = vunpack.c.l.b16 %v966_v32  ;;  %v619_v9 = vrot.slane %v618_v59, 2  ;;  %v625_v10 = vmax.f32 %v623_v50, %v624_v1  ;;  %v632_v11 = vmax.f32 %v630_v51, %v631_v0 }
 0x176   :  { %v613_v13 = vmax.f32 %v611_v38, %v612_v57  ;;  %v638_v14 = vrot.slane %v637_v60, 4  ;;  %v473_v16 = vcombine.high %v397_v58, %v397_v58  ;;  %v480_v17 = vrot.slane %v397_v58, %v3560_v2 }
 0x177   :  { %v713_v18 = vadd.f32 %v3573_v39, %v601_v4  ;;  %v620_v20 = vmax.f32 %v618_v59, %v619_v9  ;;  %v626_v21 = vrot.slane %v625_v10, 2  ;;  %v633_v22 = vrot.slane %v632_v11, 2 }
 0x178   :  { %v3626_v23 = vunpack.c.l.b16 %v967_v3  ;;  %v607_v25 = vrot.slane %v606_v5, 1  ;;  %v760_v26 = vmul.f32 0.01, %v712_v6  ;;  %v3628_v27 = vmax.f32 %v388_v52, %v390_v12 }
 0x179   :  { %vm736_vm3 = vcmp.ge.f32.partialorder %v712_v6, 0.0  ;;  %v621_v28 = vrot.slane %v620_v20, 1  ;;  %v627_v29 = vmax.f32 %v625_v10, %v626_v21  ;;  %v634_v30 = vmax.f32 %v632_v11, %v633_v22 }
 0x17a   :  { %v614_v32 = vrot.slane %v613_v13, 1  ;;  %v639_v33 = vmax.f32 %v637_v60, %v638_v14  ;;  %v487_v34 = vrot.slane %v473_v16, %v3560_v2  ;;  %v488_v36 = vcombine.high %v480_v17, %v480_v17 }
 0x17b   :  { %v761_v35 = vmul.f32 0.01, %v713_v18  ;;  %v622_v19 = vmax.f32 %v620_v20, %v621_v28  ;;  %v628_v38 = vrot.slane %v627_v29, 1  ;;  %v635_v40 = vrot.slane %v634_v30, 1 }
 0x17c   :  { %vm737_vm4 = vcmp.ge.f32.partialorder %v713_v18, 0.0  ;;  %v784_v41 = vsel %vm736_vm3, %v712_v6, %v760_v26  ;;  %v640_v42 = vrot.slane %v639_v33, 2  ;;  %v644_v43 = vsel %vm531_vm9, %v480_v17, -inf }
 0x17d   :  { %v3632_v45 = vmax.f32 %v606_v5, %v607_v25  ;;  %v629_v46 = vmax.f32 %v627_v29, %v628_v38  ;;  %v636_v47 = vmax.f32 %v634_v30, %v635_v40  ;;  %v716_v48 = vadd.f32 %v3573_v39, %v622_v19 }
 0x17e   :  { %v641_v49 = vmax.f32 %v639_v33, %v640_v42  ;;  %v645_v50 = vrot.slane %v644_v43, 4  ;;  %v651_v51 = vsel %vm531_vm9, %v488_v36, -inf  ;;  %v658_v52 = vsel %vm531_vm9, %v487_v34, -inf }
 0x17f   :  { %v785_v53 = vsel %vm737_vm4, %v713_v18, %v761_v35  ;;  %v976_v55 = vpack.c.bf16 %v784_v41, %v784_v41  ;;  %v717_v57 = vadd.f32 %v3573_v39, %v629_v46  ;;  %v718_v58 = vadd.f32 %v3573_v39, %v636_v47 }
 0x180   :  { %v642_v59 = vrot.slane %v641_v49, 1  ;;  %v646_v1 = vmax.f32 %v644_v43, %v645_v50  ;;  %v652_v0 = vrot.slane %v651_v51, 4  ;;  %v659_v60 = vrot.slane %v658_v52, 4 }
 0x181   :  { %vm740_vm5 = vcmp.ge.f32.partialorder %v716_v48, 0.0  ;;  %v764_v3 = vmul.f32 0.01, %v716_v48  ;;  %v765_v4 = vmul.f32 0.01, %v717_v57  ;;  %v489_v5 = vcombine.high %v487_v34, %v487_v34 }
 0x182   :  { %v643_v6 = vmax.f32 %v641_v49, %v642_v59  ;;  %v766_v9 = vmul.f32 0.01, %v718_v58  ;;  %v647_v10 = vrot.slane %v646_v1, 2  ;;  %v653_v11 = vmax.f32 %v651_v51, %v652_v0 }
 0x183   :  { %v3639_v12 = vmax.f32 %v613_v13, %v614_v32  ;;  %vm741_vm6 = vcmp.ge.f32.partialorder %v717_v57, 0.0  ;;  %vm742_vm7 = vcmp.ge.f32.partialorder %v718_v58, 0.0  ;;  %v660_v14 = vmax.f32 %v658_v52, %v659_v60 }
 0x184   :  { %v3641_v16 = vunpack.c.l.b16 %v976_v55  ;;  %v1327_v17 = vpack.c.bf16 %v785_v53, %v785_v53  ;;  %v719_v18 = vadd.f32 %v3573_v39, %v643_v6  ;;  %v648_v20 = vmax.f32 %v646_v1, %v647_v10 }
 0x185   :  { %v788_v21 = vsel %vm740_vm5, %v716_v48, %v764_v3  ;;  %v654_v22 = vrot.slane %v653_v11, 2  ;;  %v661_v25 = vrot.slane %v660_v14, 2  ;;  %v665_v26 = vsel %vm531_vm9, %v489_v5, -inf }
 0x186   :  { %vm743_vm8 = vcmp.ge.f32.partialorder %v719_v18, 0.0  ;;  %v767_v28 = vmul.f32 0.01, %v719_v18  ;;  %v789_v29 = vsel %vm741_vm6, %v717_v57, %v765_v4  ;;  %v790_v13 = vsel %vm742_vm7, %v718_v58, %v766_v9 }
 0x187   :  { %v649_v30 = vrot.slane %v648_v20, 1  ;;  %v655_v32 = vmax.f32 %v653_v11, %v654_v22  ;;  %v662_v33 = vmax.f32 %v660_v14, %v661_v25  ;;  %v666_v34 = vrot.slane %v665_v26, 4 }
 0x188   :  { %v3646_v36 = vunpack.c.l.b16 %v1327_v17  ;;  %v791_v35 = vsel %vm743_vm8, %v719_v18, %v767_v28  ;;  %v968_v19 = vpack.c.bf16 %v788_v21, %v788_v21  ;;  %v490_v38 = vcombine.high %v3628_v27, %v3628_v27 }
 0x189   :  { %v969_v40 = vpack.c.bf16 %v789_v29, %v789_v29  ;;  %v650_v41 = vmax.f32 %v648_v20, %v649_v30  ;;  %v656_v42 = vrot.slane %v655_v32, 1  ;;  %v663_v43 = vrot.slane %v662_v33, 1 }
 0x18a   :  { %v970_v46 = vpack.c.bf16 %v790_v13, %v790_v13  ;;  %v971_v47 = vpack.c.bf16 %v791_v35, %v791_v35  ;;  %v667_v48 = vmax.f32 %v665_v26, %v666_v34  ;;  %v497_v49 = vrot.slane %v3628_v27, %v3560_v2 }
 0x18b   :  { %v657_v50 = vmax.f32 %v655_v32, %v656_v42  ;;  %v664_v51 = vmax.f32 %v662_v33, %v663_v43  ;;  %v720_v52 = vadd.f32 %v3573_v39, %v650_v41  ;;  %v504_v53 = vrot.slane %v490_v38, %v3560_v2 }
 0x18c   :  { %v3654_v55 = vunpack.c.l.b16 %v968_v19  ;;  %v668_v57 = vrot.slane %v667_v48, 2  ;;  %v505_v58 = vcombine.high %v497_v49, %v497_v49  ;;  %v672_v59 = vsel %vm531_vm9, %v497_v49, -inf }
 0x18d   :  { %v3657_v1 = vunpack.c.l.b16 %v969_v40  ;;  %v721_v0 = vadd.f32 %v3573_v39, %v657_v50  ;;  %v722_v60 = vadd.f32 %v3573_v39, %v664_v51  ;;  %vm744_vm10 = vcmp.ge.f32.partialorder %v720_v52, 0.0 }
 0x18e   :  { %v669_v27 = vmax.f32 %v667_v48, %v668_v57  ;;  %v768_v3 = vmul.f32 0.01, %v720_v52  ;;  %v673_v4 = vrot.slane %v672_v59, 4  ;;  %v679_v5 = vsel %vm531_vm9, %v505_v58, -inf }
 0x18f   :  { %v3662_v6 = vunpack.c.l.b16 %v971_v47  ;;  %vm745_vm11 = vcmp.ge.f32.partialorder %v721_v0, 0.0  ;;  %v769_v9 = vmul.f32 0.01, %v721_v0  ;;  %v506_v10 = vcombine.high %v504_v53, %v504_v53 }
 0x190   :  { %vm1014_vm12 = vcmask 1042434   ;;  %v670_v11 = vrot.slane %v669_v27, 1  ;;  %v770_v14 = vmul.f32 0.01, %v722_v60  ;;  %v792_v17 = vsel %vm744_vm10, %v720_v52, %v768_v3 }
 0x191   :  { %v674_v18 = vmax.f32 %v672_v59, %v673_v4  ;;  %v3664_v20 = vunpack.c.l.b16 %v970_v46  ;;  %vm746_vm13 = vcmp.ge.f32.partialorder %v722_v60, 0.0  ;;  %v680_v21 = vrot.slane %v679_v5, 4 }
 0x192   :  { %v686_v22 = vsel %vm531_vm9, %v504_v53, -inf  ;;  %vm1017_vm14 = vcmask 1043459   ;;  %v1188_v25 = vrot.slane %v3657_v1, 7  ;;  %v671_v26 = vmax.f32 %v669_v27, %v670_v11 }
 0x193   :  { %v793_v28 = vsel %vm745_vm11, %v721_v0, %v769_v9  ;;  %v675_v29 = vrot.slane %v674_v18, 2  ;;  %vm1020_vm0 = vcmask 1044484   ;;  %v1347_v13 = vrot.slane %v3662_v6, 7 }
 0x194   :  { %v972_v30 = vpack.c.bf16 %v792_v17, %v792_v17  ;;  %v681_v32 = vmax.f32 %v679_v5, %v680_v21  ;;  %v687_v33 = vrot.slane %v686_v22, 4  ;;  %vm1023_vm1 = vcmask 1045509  }
 0x195   :  { %v723_v34 = vadd.f32 %v3573_v39, %v671_v26  ;;  %v794_v35 = vsel %vm746_vm13, %v722_v60, %v770_v14  ;;  %v676_v19 = vmax.f32 %v674_v18, %v675_v29  ;;  %v693_v38 = vsel %vm531_vm9, %v506_v10, -inf }
 0x196   :  { %v973_v40 = vpack.c.bf16 %v793_v28, %v793_v28  ;;  %v682_v41 = vrot.slane %v681_v32, 2  ;;  %v688_v42 = vmax.f32 %v686_v22, %v687_v33  ;;  %v694_v43 = vrot.slane %v693_v38, 4 }
 0x197   :  { %vm1026_vm2 = vcmask 1046534   ;;  %vm747_vm3 = vcmp.ge.f32.partialorder %v723_v34, 0.0  ;;  %v771_v46 = vmul.f32 0.01, %v723_v34  ;;  %v677_v47 = vrot.slane %v676_v19, 1 }
 0x198   :  { %v1010_v48 = vrot.slane %v3594_v61, 7  ;;  %v683_v49 = vmax.f32 %v681_v32, %v682_v41  ;;  %v689_v50 = vrot.slane %v688_v42, 2  ;;  %v695_v51 = vmax.f32 %v693_v38, %v694_v43  ;;  %v3090_v61 = vld [vmem:[%s4292_s2 + $0x254] ss:$8 sps:$4 sm:$0xff]  }
 0x199   :  { %v1013_v52 = vrot.slane %v3590_v56, 6  ;;  %vm1029_vm4 = vcmask 1047559   ;;  %v795_v53 = vsel %vm747_vm3, %v723_v34, %v771_v46  ;;  %v678_v57 = vmax.f32 %v676_v19, %v677_v47 }
 0x19a   :  { %v1012_v58 = vsel %vm1011_vm15, %v1010_v48, %v3588_v54  ;;  %v1016_v59 = vrot.slane %v3611_v37, 5  ;;  %v974_v0 = vpack.c.bf16 %v794_v35, %v794_v35  ;;  %v684_v60 = vrot.slane %v683_v49, 1 }
 0x19b   :  { %v690_v27 = vmax.f32 %v688_v42, %v689_v50  ;;  %v696_v3 = vrot.slane %v695_v51, 2  ;;  %v724_v4 = vadd.f32 %v3573_v39, %v678_v57  ;;  %v1015_v5 = vsel %vm1014_vm12, %v1013_v52, %v1012_v58 }
 0x19c   :  { %v1019_v9 = vrot.slane %v3616_v44, 4  ;;  %v1022_v10 = vrot.slane %v3622_v7, 3  ;;  %v975_v11 = vpack.c.bf16 %v795_v53, %v795_v53  ;;  %v3680_v14 = vunpack.c.l.b16 %v972_v30 }
 0x19d   :  { %v3682_v17 = vunpack.c.l.b16 %v973_v40  ;;  %v685_v18 = vmax.f32 %v683_v49, %v684_v60  ;;  %vm748_vm5 = vcmp.ge.f32.partialorder %v724_v4, 0.0  ;;  %v772_v21 = vmul.f32 0.01, %v724_v4 }
 0x19e   :  { %v1018_v22 = vsel %vm1017_vm14, %v1016_v59, %v1015_v5  ;;  %v1025_v26 = vrot.slane %v3626_v23, 2  ;;  %v691_v28 = vrot.slane %v690_v27, 1  ;;  %v697_v29 = vmax.f32 %v695_v51, %v696_v3 }
 0x19f   :  { %v725_v32 = vadd.f32 %v3573_v39, %v685_v18  ;;  %v1021_v33 = vsel %vm1020_vm0, %v1019_v9, %v1018_v22  ;;  %v796_v34 = vsel %vm748_vm5, %v724_v4, %v772_v21  ;;  %v1028_v30 = vrot.slane %v3641_v16, 1 }
 0x1a0   :  { %v1024_v35 = vsel %vm1023_vm1, %v1022_v10, %v1021_v33  ;;  %v1031_v19 = vrot.slane %v3664_v20, 7  ;;  %v3691_v38 = vunpack.c.l.b16 %v974_v0  ;;  %v3693_v40 = vunpack.c.l.b16 %v975_v11 }
 0x1a1   :  { %vm749_vm6 = vcmp.ge.f32.partialorder %v725_v32, 0.0  ;;  %v773_v41 = vmul.f32 0.01, %v725_v32  ;;  %v977_v42 = vpack.c.bf16 %v796_v34, %v796_v34  ;;  %v1027_v43 = vsel %vm1026_vm2, %v1025_v26, %v1024_v35 }
 0x1a2   :  { %v1032_v46 = vsel %vm1011_vm15, %v1031_v19, %v3657_v1  ;;  %v1033_v47 = vrot.slane %v3662_v6, 6  ;;  %v1348_v48 = vsel %vm1011_vm15, %v1347_v13, %v3664_v20  ;;  %v692_v49 = vmax.f32 %v690_v27, %v691_v28 }
 0x1a3   :  { %v698_v50 = vrot.slane %v697_v29, 1  ;;  %v797_v51 = vsel %vm749_vm6, %v725_v32, %v773_v41  ;;  %v3701_v52 = vunpack.c.l.b16 %v977_v42  ;;  %v1030_v57 = vsel %vm1029_vm4, %v1028_v30, %v1027_v43  ;;  %v3073_v42 = vld [vmem:[%s4292_s2 + $0x70] ss:$8 sps:$4 sm:$0xff]  }
 0x1a4   :  { %v1328_v53 = vpack.c.bf16 %v797_v51, %v797_v51  ;;  %v1034_v58 = vsel %vm1014_vm12, %v1033_v47, %v1032_v46  ;;  %v1035_v59 = vrot.slane %v3680_v14, 5  ;;  %v1037_v0 = vrot.slane %v3682_v17, 4 }
 0x1a5   :  { %v1039_v60 = vrot.slane %v3691_v38, 3  ;;  %v1041_v3 = vrot.slane %v3693_v40, 2  ;;  %v1043_v13 = vrot.slane %v3701_v52, 1  ;;  %v1335_v27 = vrot.slane %v3611_v37, 6 }
 0x1a6   :  { %v3709_v4 = vunpack.c.l.b16 %v1328_v53  ;;  %v1337_v5 = vrot.slane %v3616_v44, 5  ;;  %v1036_v9 = vsel %vm1017_vm14, %v1035_v59, %v1034_v58  ;;  %v1339_v10 = vrot.slane %v3622_v7, 4 }
 0x1a7   :  { %v1341_v11 = vrot.slane %v3626_v23, 3  ;;  %v1343_v18 = vrot.slane %v3641_v16, 2  ;;  %v1038_v21 = vsel %vm1020_vm0, %v1037_v0, %v1036_v9  ;;  %v1336_v22 = vsel %vm1014_vm12, %v1335_v27, %v3608_v31  ;;  %v3081_v0 = vld [vmem:[%s4292_s2 + $0x64] ss:$8 sps:$4 sm:$0xff]  }
 0x1a8   :  { %v1345_v26 = vrot.slane %v3646_v36, 1  ;;  %v1349_v28 = vrot.slane %v3680_v14, 6  ;;  %v1040_v32 = vsel %vm1023_vm1, %v1039_v60, %v1038_v21  ;;  %v1338_v33 = vsel %vm1017_vm14, %v1337_v5, %v1336_v22 }
 0x1a9   :  { %v1351_v34 = vrot.slane %v3682_v17, 5  ;;  %v1353_v35 = vrot.slane %v3691_v38, 4  ;;  %v1042_v30 = vsel %vm1026_vm2, %v1041_v3, %v1040_v32  ;;  %v1340_v19 = vsel %vm1020_vm0, %v1339_v10, %v1338_v33 }
 0x1aa   :  { %v1350_v41 = vsel %vm1014_vm12, %v1349_v28, %v1348_v48  ;;  %v1355_v31 = vrot.slane %v3693_v40, 3  ;;  %v1044_v43 = vsel %vm1029_vm4, %v1043_v13, %v1042_v30  ;;  %v1342_v46 = vsel %vm1023_vm1, %v1341_v11, %v1340_v19  ;;  %v3085_v11 = vld [vmem:[%s4292_s2 + $0x50] ss:$8 sps:$4 sm:$0xff]  }
 0x1ab   :  { %v1352_v47 = vsel %vm1017_vm14, %v1351_v34, %v1350_v41  ;;  %v1357_v51 = vrot.slane %v3701_v52, 2  ;;  %v1045_v53 = vpack.c.b16 %v1044_v43, %v1030_v57  ;;  %v1344_v58 = vsel %vm1026_vm2, %v1343_v18, %v1342_v46  ;;  %v3091_v43 = vld [vmem:[%s4292_s2 + $0x40] ss:$8 sps:$4 sm:$0xff]  }
 0x1ac   :  { %v1354_v59 = vsel %vm1020_vm0, %v1353_v35, %v1352_v47  ;;  %v1359_v48 = vrot.slane %v3709_v4, 1  ;;  %v1175_v60 = vsel %vm1011_vm15, %v1174_v63, %v3596_v62  ;;  %v699_v3 = vmax.f32 %v697_v29, %v698_v50  ;;  %v3076_v62 = vld [vmem:[%s4292_s2 + $0x270] ss:$8 sps:$4 sm:$0xff]   ;;  %v3084_v29 = vld [vmem:[%s4292_s2 + $0x264] ss:$8 sps:$4 sm:$0xff]  }
 0x1ad   :  { %v1356_v13 = vsel %vm1023_vm1, %v1355_v31, %v1354_v59  ;;  %v714_v57 = vadd.f32 %v3573_v39, %v3632_v45  ;;  %v1189_v27 = vsel %vm1011_vm15, %v1188_v25, %v3654_v55  ;;  %v1190_v5 = vrot.slane %v3664_v20, 6  ;;  %1160 = vmatmul.mubr.bf16.vlgmr.msra.gmra.mxu1 %v1045_v53  ;;  %v3079_v55 = vld [vmem:[%s4292_s2 + $0x60] ss:$8 sps:$4 sm:$0xff]   ;;  %v3099_v53 = vld [vmem:[%s4292_s2 + $0x34] ss:$8 sps:$4 sm:$0xff]  }
 0x1ae   :  { %v1358_v9 = vsel %vm1026_vm2, %v1357_v51, %v1356_v13  ;;  %v726_v54 = vadd.f32 %v3573_v39, %v692_v49  ;;  %1285 = vmatpush1.bf16.msra.mxu1 %v3073_v42  ;;  %v1346_v63 = vsel %vm1029_vm4, %v1345_v26, %v1344_v58  ;;  %1316 = vmatprep.mubr.bf16.mxu1 %v3216_v8  ;;  %v1178_v1 = vrot.slane %v3590_v56, 5  ;;  %v3087_v49 = vld [vmem:[%s4292_s2 + $0x54] ss:$8 sps:$4 sm:$0xff]   ;;  %v3093_v26 = vld [vmem:[%s4292_s2 + $0x44] ss:$8 sps:$4 sm:$0xff]  }
 0x1af   :  { %v1360_v45 = vsel %vm1029_vm4, %v1359_v48, %v1358_v9  ;;  %v715_v20 = vadd.f32 %v3573_v39, %v3639_v12  ;;  %1286 = vmatprep.subr.bf16.mxu1 %v3081_v0  ;;  %v1177_v50 = vsel %vm1014_vm12, %v1176_v24, %v1175_v60  ;;  %v727_v10 = vadd.f32 %v3573_v39, %v699_v3  ;;  %v3082_v12 = vld [vmem:[%s4292_s2 + $0x260] ss:$8 sps:$4 sm:$0xff]   ;;  %v3088_v42 = vld [vmem:[%s4292_s2 + $0x250] ss:$8 sps:$4 sm:$0xff]   ;;  %v3096_v51 = vld [vmem:[%s4292_s2 + $0x244] ss:$8 sps:$4 sm:$0xff]  }
 0x1b0   :  { %v1361_v25 = vpack.c.b16 %v1360_v45, %v1346_v63  ;;  %v1192_v18 = vrot.slane %v3662_v6, 5  ;;  %v762_v21 = vmul.f32 0.01, %v714_v57  ;;  %v1180_v24 = vrot.slane %v3611_v37, 4  ;;  %v3097_v63 = vld [vmem:[%s4292_s2 + $0x30] ss:$8 sps:$4 sm:$0xff]  }
 0x1b1   :  { %v1191_v39 = vsel %vm1014_vm12, %v1190_v5, %v1189_v27  ;;  %vm738_vm7 = vcmp.ge.f32.partialorder %v714_v57, 0.0  ;;  %v774_v22 = vmul.f32 0.01, %v726_v54  ;;  %v1179_v28 = vsel %vm1017_vm14, %v1178_v1, %v1177_v50 }
 0x1b2   :  { %1476 = vmatmul.mubr.bf16.vlgmr.msra.gmra.mxu0 %v1361_v25  ;;  %1287 = vmatpush1.bf16.msra.mxu1 %v3079_v55  ;;  %vm750_vm8 = vcmp.ge.f32.partialorder %v726_v54, 0.0  ;;  %v1182_v32 = vrot.slane %v3616_v44, 3  ;;  %v1194_v33 = vrot.slane %v3680_v14, 4  ;;  %v763_v34 = vmul.f32 0.01, %v715_v20 }
 0x1b3   :  { %1770 = vmatpush1.bf16.msra.mxu0 %v3076_v62  ;;  %1288 = vmatprep.subr.bf16.mxu1 %v3087_v49  ;;  %v1193_v35 = vsel %vm1017_vm14, %v1192_v18, %v1191_v39  ;;  %vm739_vm10 = vcmp.ge.f32.partialorder %v715_v20, 0.0  ;;  %v775_v30 = vmul.f32 0.01, %v727_v10  ;;  %v1659_v19 = vrot.slane %v3616_v44, 7  ;;  %v3094_v62 = vld [vmem:[%s4292_s2 + $0x240] ss:$8 sps:$4 sm:$0xff]  }
 0x1b4   :  { %1771 = vmatprep.subr.bf16.mxu0 %v3084_v29  ;;  %1801 = vmatprep.mubr.bf16.mxu0 %v3216_v8  ;;  %v1181_v41 = vsel %vm1020_vm0, %v1180_v24, %v1179_v28  ;;  %vm751_vm11 = vcmp.ge.f32.partialorder %v727_v10, 0.0  ;;  %v786_v31 = vsel %vm738_vm7, %v714_v57, %v762_v21  ;;  %v1196_v46 = vrot.slane %v3682_v17, 3  ;;  %v3102_v25 = vld [vmem:[%s4292_s2 + $0x234] ss:$8 sps:$4 sm:$0xff]   ;;  %v3105_v29 = vld [vmem:[%s4292_s2 + $0x24] ss:$8 sps:$4 sm:$0xff]  }
 0x1b5   :  { %v798_v47 = vsel %vm750_vm8, %v726_v54, %v774_v22  ;;  %v1184_v58 = vrot.slane %v3622_v7, 2  ;;  %v1195_v59 = vsel %vm1020_vm0, %v1194_v33, %v1193_v35  ;;  %v3820_v48 = vsel %vm739_vm10, %v715_v20, %v763_v34  ;;  %v3100_v28 = vld [vmem:[%s4292_s2 + $0x230] ss:$8 sps:$4 sm:$0xff]   ;;  %v3108_v35 = vld [vmem:[%s4292_s2 + $0x224] ss:$8 sps:$4 sm:$0xff]  }
 0x1b6   :  { %1289 = vmatpush1.bf16.msra.mxu1 %v3085_v11  ;;  %v1661_v0 = vrot.slane %v3622_v7, 6  ;;  %v3824_v60 = vsel %vm1023_vm1, %v1182_v32, %v1181_v41  ;;  %v3827_v3 = vsel %vm751_vm11, %v727_v10, %v775_v30  ;;  %v1490_v13 = vpack.c.bf16 %v786_v31, %v786_v31  ;;  %v3111_v30 = vld [vmem:[%s4292_s2 + $0x14] ss:$8 sps:$4 sm:$0xff]  }
 0x1b7   :  { %1772 = vmatpush1.bf16.msra.mxu0 %v3082_v12  ;;  %1290 = vmatprep.subr.bf16.mxu1 %v3093_v26  ;;  %v1660_v57 = vsel %vm1011_vm15, %v1659_v19, %v3611_v37  ;;  %v1198_v27 = vrot.slane %v3691_v38, 2  ;;  %v1491_v5 = vpack.c.bf16 %v798_v47, %v798_v47  ;;  %v1673_v9 = vrot.slane %v3682_v17, 7 }
 0x1b8   :  { %1773 = vmatprep.subr.bf16.mxu0 %v3090_v61  ;;  %v1675_v54 = vrot.slane %v3691_v38, 6  ;;  %v3841_v45 = vsel %vm1023_vm1, %v1196_v46, %v1195_v59  ;;  %v1200_v55 = vrot.slane %v3693_v40, 1  ;;  %v1653_v1 = vpack.c.bf16 %v3820_v48, %v3820_v48 }
 0x1b9   :  { %v1663_v20 = vrot.slane %v3626_v23, 5  ;;  %v1654_v49 = vpack.c.bf16 %v3827_v3, %v3827_v3  ;;  %v1662_v50 = vsel %vm1014_vm12, %v1661_v0, %v1660_v57  ;;  %v1674_v10 = vsel %vm1011_vm15, %v1673_v9, %v3680_v14  ;;  %v3114_v57 = vld [vmem:[%s4292_s2 + $0x214] ss:$8 sps:$4 sm:$0xff]  }
 0x1ba   :  { %1291 = vmatpush1.bf16.msra.mxu1 %v3091_v43  ;;  %v1677_v12 = vrot.slane %v3693_v40, 5  ;;  %v3859_v11 = vunpack.c.l.b16 %v1490_v13  ;;  %v1676_v18 = vsel %vm1014_vm12, %v1675_v54, %v1674_v10  ;;  %v1496_v21 = vrot.slane %v3611_v37, 7  ;;  %v3103_v37 = vld [vmem:[%s4292_s2 + $0x20] ss:$8 sps:$4 sm:$0xff]  }
 0x1bb   :  { %1774 = vmatpush1.bf16.msra.mxu0 %v3088_v42  ;;  %1292 = vmatprep.subr.bf16.mxu1 %v3099_v53  ;;  %v1498_v61 = vrot.slane %v3616_v44, 6  ;;  %v3864_v24 = vunpack.c.l.b16 %v1491_v5  ;;  %v1665_v39 = vrot.slane %v3641_v16, 4  ;;  %v1500_v22 = vrot.slane %v3622_v7, 5  ;;  %v3117_v5 = vld [vmem:[%s4292_s2 + $0x4] ss:$8 sps:$4 sm:$0xff]  }
 0x1bc   :  { %1775 = vmatprep.subr.bf16.mxu0 %v3096_v51  ;;  %v1502_v26 = vrot.slane %v3626_v23, 4  ;;  %v1664_v44 = vsel %vm1017_vm14, %v1663_v20, %v1662_v50  ;;  %v1679_v32 = vrot.slane %v3701_v52, 4  ;;  %v1497_v33 = vsel %vm1011_vm15, %v1496_v21, %v3590_v56  ;;  %v3120_v21 = vld [vmem:[%s4292_s2 + $0x204] ss:$8 sps:$4 sm:$0xff]  }
 0x1bd   :  { %v1504_v34 = vrot.slane %v3641_v16, 3  ;;  %v1678_v19 = vsel %vm1017_vm14, %v1677_v12, %v1676_v18  ;;  %v1499_v41 = vsel %vm1014_vm12, %v1498_v61, %v1497_v33  ;;  %v1506_v31 = vrot.slane %v3646_v36, 2  ;;  %v3124_v33 = vld [vmem:[%s4292_s2 + $0x1e0] ss:$8 sps:$4 sm:$0xff]  }
 0x1be   :  { %1293 = vmatpush1.bf16.msra.mxu1 %v3097_v63  ;;  %v1510_v56 = vrot.slane %v3680_v14, 7  ;;  %v1501_v16 = vsel %vm1017_vm14, %v1500_v22, %v1499_v41  ;;  %v1508_v42 = vrot.slane %v3859_v11, 1  ;;  %v1512_v43 = vrot.slane %v3682_v17, 6  ;;  %v3106_v14 = vld [vmem:[%s4292_s2 + $0x220] ss:$8 sps:$4 sm:$0xff]  }
 0x1bf   :  { %1776 = vmatpush1.bf16.msra.mxu0 %v3094_v62  ;;  %1294 = vmatprep.subr.bf16.mxu1 %v3105_v29  ;;  %v1514_v46 = vrot.slane %v3691_v38, 5  ;;  %v1681_v47 = vrot.slane %v3709_v4, 3  ;;  %v1503_v51 = vsel %vm1020_vm0, %v1502_v26, %v1501_v16  ;;  %v1516_v59 = vrot.slane %v3693_v40, 4  ;;  %v3109_v17 = vld [vmem:[%s4292_s2 + $0x10] ss:$8 sps:$4 sm:$0xff]  }
 0x1c0   :  { %1777 = vmatprep.subr.bf16.mxu0 %v3102_v25  ;;  %v1511_v53 = vsel %vm1011_vm15, %v1510_v56, %v3662_v6  ;;  %v1680_v0 = vsel %vm1020_vm0, %v1679_v32, %v1678_v19  ;;  %v1505_v3 = vsel %vm1023_vm1, %v1504_v34, %v1503_v51  ;;  %v1518_v6 = vrot.slane %v3701_v52, 3  ;;  %v3121_v40 = vld [vmem:[%s4292_s2 + $0x1f0] ss:$8 sps:$4 sm:$0xff]   ;;  %v3132_v19 = vld [vmem:[%s4292_s2 + $0x1c4] ss:$8 sps:$4 sm:$0xff]  }
 0x1c1   :  { %v1513_v13 = vsel %vm1014_vm12, %v1512_v43, %v1511_v53  ;;  %v1507_v9 = vsel %vm1026_vm2, %v1506_v31, %v1505_v3  ;;  %v1520_v62 = vrot.slane %v3709_v4, 2  ;;  %v1522_v63 = vrot.slane %v3864_v24, 1  ;;  %v3130_v41 = vld [vmem:[%s4292_s2 + $0x1c0] ss:$8 sps:$4 sm:$0xff]   ;;  %v3133_v31 = vld [vmem:[%s4292_s2 + $0x1b0] ss:$8 sps:$4 sm:$0xff]  }
 0x1c2   :  { %1295 = vmatpush1.bf16.msra.mxu1 %v3103_v37  ;;  %v1515_v54 = vsel %vm1017_vm14, %v1514_v46, %v1513_v13  ;;  %v1658_v20 = vunpack.c.l.b16 %v1654_v49  ;;  %v1667_v52 = vrot.slane %v3646_v36, 3  ;;  %v3921_v25 = vsel %vm1029_vm4, %v1508_v42, %v1507_v9  ;;  %v3112_v36 = vld [vmem:[%s4292_s2 + $0x210] ss:$8 sps:$4 sm:$0xff]   ;;  %v3115_v49 = vld [vmem:[%s4292_s2] ss:$8 sps:$4 sm:$0xff]  }
 0x1c3   :  { %1778 = vmatpush1.bf16.msra.mxu0 %v3100_v28  ;;  %1296 = vmatprep.subr.bf16.mxu1 %v3111_v30  ;;  %v1517_v29 = vsel %vm1020_vm0, %v1516_v59, %v1515_v54  ;;  %v1199_v50 = vsel %vm1026_vm2, %v1198_v27, %v3841_v45  ;;  %v1666_v10 = vsel %vm1020_vm0, %v1665_v39, %v1664_v44  ;;  %v1683_v12 = vrot.slane %v3864_v24, 2  ;;  %v3126_v37 = vld [vmem:[%s4292_s2 + $0x1e4] ss:$8 sps:$4 sm:$0xff]   ;;  %v3127_v30 = vld [vmem:[%s4292_s2 + $0x1d0] ss:$8 sps:$4 sm:$0xff]  }
 0x1c4   :  { %1779 = vmatprep.subr.bf16.mxu0 %v3108_v35  ;;  %v1519_v4 = vsel %vm1023_vm1, %v1518_v6, %v1517_v29  ;;  %v1186_v38 = vrot.slane %v3626_v23, 1  ;;  %v1657_v27 = vunpack.c.l.b16 %v1653_v1  ;;  %v1682_v45 = vsel %vm1023_vm1, %v1681_v47, %v1680_v0  ;;  %v3123_v23 = vld [vmem:[%s4292_s2 + $0x1f4] ss:$8 sps:$4 sm:$0xff]   ;;  %v3138_v56 = vld [vmem:[%s4292_s2 + $0x1a4] ss:$8 sps:$4 sm:$0xff]  }
 0x1c5   :  { %v1521_v18 = vsel %vm1026_vm2, %v1520_v62, %v1519_v4  ;;  %v1185_v61 = vsel %vm1026_vm2, %v1184_v58, %v3824_v60  ;;  %v1669_v48 = vrot.slane %v3859_v11, 2  ;;  %v1201_v24 = vsel %vm1029_vm4, %v1200_v55, %v1199_v50  ;;  %v3118_v58 = vld [vmem:[%s4292_s2 + $0x200] ss:$8 sps:$4 sm:$0xff]   ;;  %v3129_v35 = vld [vmem:[%s4292_s2 + $0x1d4] ss:$8 sps:$4 sm:$0xff]  }
 0x1c6   :  { %1297 = vmatpush1.bf16.msra.mxu1 %v3109_v17  ;;  %v1523_v1 = vsel %vm1029_vm4, %v1522_v63, %v1521_v18  ;;  %v1668_v39 = vsel %vm1023_vm1, %v1667_v52, %v1666_v10  ;;  %v1685_v22 = vrot.slane %v1658_v20, 1  ;;  %v1684_v7 = vsel %vm1026_vm2, %v1683_v12, %v1682_v45  ;;  %v3136_v16 = vld [vmem:[%s4292_s2 + $0x1a0] ss:$8 sps:$4 sm:$0xff]   ;;  %v3141_v42 = vld [vmem:[%s4292_s2 + $0x194] ss:$8 sps:$4 sm:$0xff]  }
 0x1c7   :  { %1780 = vmatpush1.bf16.msra.mxu0 %v3106_v14  ;;  %1298 = vmatprep.subr.bf16.mxu1 %v3117_v5  ;;  %v1524_v26 = vpack.c.b16 %v1523_v1, %v3921_v25  ;;  %v1187_v60 = vsel %vm1029_vm4, %v1186_v38, %v1185_v61  ;;  %v1671_v55 = vrot.slane %v1657_v27, 1  ;;  %v1670_v28 = vsel %vm1026_vm2, %v1669_v48, %v1668_v39  ;;  %v3139_v43 = vld [vmem:[%s4292_s2 + $0x190] ss:$8 sps:$4 sm:$0xff]   ;;  %v3144_v46 = vld [vmem:[%s4292_s2 + $0x184] ss:$8 sps:$4 sm:$0xff]  }
 0x1c8   :  { %1781 = vmatprep.subr.bf16.mxu0 %v3114_v57  ;;  %v1202_v11 = vpack.c.b16 %v1201_v24, %v1187_v60  ;;  %v1686_v44 = vsel %vm1029_vm4, %v1685_v22, %v1684_v7  ;;  %v3142_v47 = vld [vmem:[%s4292_s2 + $0x180] ss:$8 sps:$4 sm:$0xff]   ;;  %vm1868_vm12 = vcmask 162816   ;;  %vm1870_vm13 = vcmask 326656  }
 0x1c9   :  { %v1672_v32 = vsel %vm1029_vm4, %v1671_v55, %v1670_v28  ;;  %vm1872_vm14 = vcmask 490496   ;;  %vm1874_vm0 = vcmask 654336   ;;  %vm3225_vm1 = vmmov 0  }
 0x1ca   :  { %1299 = vmatpush1.bf16.msra.mxu1 %v3115_v49  ;;  %v1687_v34 = vpack.c.b16 %v1686_v44, %v1672_v32 }
 0x1cb   :  { %1782 = vmatpush1.bf16.msra.mxu0 %v3112_v36  ;;  %1606 = vmatprep.subr.bf16.mxu1 %v3123_v23 }
 0x1cc   :  { %1783 = vmatprep.subr.bf16.mxu0 %v3120_v21 }
 0x1cd   :  { %1317 = vmatmul.mubr.bf16.vlgmr.msra.gmra.mxu1 %v1202_v11 }
 0x1ce   :  { %1607 = vmatpush1.bf16.msra.mxu1 %v3121_v40  ;;  %1638 = vmatprep.mubr.bf16.mxu1 %v3216_v8  ;;  %v3135_v8 = vld [vmem:[%s4292_s2 + $0x1b4] ss:$8 sps:$4 sm:$0xff]   ;;  %s3218_s2 = smov 88  }
 0x1cf   :  { %1784 = vmatpush1.bf16.msra.mxu0 %v3118_v58  ;;  %1608 = vmatprep.subr.bf16.mxu1 %v3126_v37 }
 0x1d2   :  { %1802 = vmatmul.mubr.bf16.vlgmr.msra.gmra.mxu0 %v1687_v34  ;;  %1609 = vmatpush1.bf16.msra.mxu1 %v3124_v33 }
 0x1d3   :  { %1610 = vmatprep.subr.bf16.mxu1 %v3129_v35 }
 0x1d6   :  { %1611 = vmatpush1.bf16.msra.mxu1 %v3127_v30 }
 0x1d7   :  { %1612 = vmatprep.subr.bf16.mxu1 %v3132_v19 }
 0x1da   :  { %1613 = vmatpush1.bf16.msra.mxu1 %v3130_v41 }
 0x1db   :  { %1614 = vmatprep.subr.bf16.mxu1 %v3135_v8 }
 0x1de   :  { %1615 = vmatpush1.bf16.msra.mxu1 %v3133_v31 }
 0x1df   :  { %1616 = vmatprep.subr.bf16.mxu1 %v3138_v56 }
 0x1e2   :  { %1617 = vmatpush1.bf16.msra.mxu1 %v3136_v16 }
 0x1e3   :  { %1618 = vmatprep.subr.bf16.mxu1 %v3141_v42 }
 0x1e6   :  { %1619 = vmatpush1.bf16.msra.mxu1 %v3139_v43 }
 0x1e7   :  { %1620 = vmatprep.subr.bf16.mxu1 %v3144_v46 }
 0x1ea   :  { %1621 = vmatpush1.bf16.msra.mxu1 %v3142_v47 }
 0x1ed   :  { %1639 = vmatmul.mubr.bf16.vlgmr.msra.gmra.mxu1 %v1524_v26 }
 0x26d   :  { %v1161_v51 = vpop.f32.mrf.mxu1 }
 0x26f   :  { %v1163_v53 = vpop.f32.mrf.mxu1 }
 0x271   :  { %v1165_v59 = vpop.f32.mrf.mxu1 }
 0x272   :  { %v1477_v14 = vpop.f32.mrf.mxu0 }
 0x273   :  { %v1167_v17 = vpop.f32.mrf.mxu1 }
 0x274   :  { %v1479_v0 = vpop.f32.mrf.mxu0 }
 0x276   :  { %v1481_v13 = vpop.f32.mrf.mxu0 }
 0x278   :  { %v1483_v57 = vpop.f32.mrf.mxu0 }
 0x28d   :  { %v1318_v3 = vpop.f32.mrf.mxu1 }
 0x28e   :  { %v1319_v54 = vadd.f32 %v1318_v3, %v1161_v51 }
 0x28f   :  { %v1320_v6 = vpop.f32.mrf.mxu1 }
 0x290   :  { %v1321_v63 = vadd.f32 %v1320_v6, %v1163_v53  ;;  %v1486_v50 = vadd.f32 %v1477_v14, %v1319_v54 }
 0x291   :  { %v1322_v5 = vpop.f32.mrf.mxu1 }
 0x292   :  { %v1803_v9 = vpop.f32.mrf.mxu0  ;;  %v1323_v20 = vadd.f32 %v1322_v5, %v1165_v59  ;;  %v1487_v4 = vadd.f32 %v1479_v0, %v1321_v63  ;;  %v1878_v0 = vsub.s32 0, %v3557_v15 }
 0x293   :  { %v1324_v62 = vpop.f32.mrf.mxu1 }
 0x294   :  { %v1805_v52 = vpop.f32.mrf.mxu0  ;;  %v1325_v29 = vadd.f32 %v1324_v62, %v1167_v17  ;;  %v1488_v36 = vadd.f32 %v1481_v13, %v1323_v20 }
 0x296   :  { %v1807_v49 = vpop.f32.mrf.mxu0  ;;  %v1489_v18 = vadd.f32 %v1483_v57, %v1325_v29 }
 0x298   :  { %v1809_v1 = vpop.f32.mrf.mxu0 }
 0x2ad   :  { %v1640_v25 = vpop.f32.mrf.mxu1 }
 0x2ae   :  { %v1649_v12 = vadd.f32 %v1640_v25, %v1486_v50 }
 0x2af   :  { %v1642_v10 = vpop.f32.mrf.mxu1 }
 0x2b0   :  { %v1650_v27 = vadd.f32 %v1642_v10, %v1487_v4  ;;  %v1812_v61 = vadd.f32 %v1803_v9, %v1649_v12 }
 0x2b1   :  { %v1644_v38 = vpop.f32.mrf.mxu1 }
 0x2b2   :  { %v1651_v45 = vadd.f32 %v1644_v38, %v1488_v36  ;;  %v1813_v24 = vadd.f32 %v1805_v52, %v1650_v27 }
 0x2b3   :  { %v1646_v21 = vpop.f32.mrf.mxu1 }
 0x2b4   :  { %v4014_v23 = vadd.f32 %v1807_v49, %v1651_v45  ;;  %v1652_v48 = vadd.f32 %v1646_v21, %v1489_v18 }
 0x2b6   :  { %v1816_v39 = vadd.f32 %v4014_v23, %v1812_v61  ;;  %v1815_v22 = vadd.f32 %v1809_v1, %v1652_v48  ;;  %v4059_v1 = vld [vmem:[%s4295_s5] sm:$0xff] }
 0x2b8   :  { %v1817_v26 = vrot.slane %v1816_v39, 4  ;;  %v1823_v7 = vadd.f32 %v1815_v22, %v1813_v24 }
 0x2ba   :  { %v1818_v58 = vadd.f32 %v1817_v26, %v1816_v39  ;;  %v1824_v60 = vrot.slane %v1823_v7, 4 }
 0x2bc   :  { %v1819_v40 = vrot.slane %v1818_v58, 2  ;;  %v1825_v55 = vadd.f32 %v1824_v60, %v1823_v7 }
 0x2be   :  { %v1820_v11 = vadd.f32 %v1819_v40, %v1818_v58  ;;  %v1826_v28 = vrot.slane %v1825_v55, 2 }
 0x2c0   :  { %v1827_v37 = vadd.f32 %v1826_v28, %v1825_v55  ;;  %v1821_v44 = vrot.slane %v1820_v11, 1 }
 0x2c2   :  { %v1822_v32 = vadd.f32 %v1821_v44, %v1820_v11  ;;  %v1828_v33 = vrot.slane %v1827_v37, 1 }
 0x2c4   :  { %1835 = vrot.lane.b32.xlu1 %v1822_v32, %s3218_s2  ;;  %1831 = vrot.lane.b32.xlu0 %v1822_v32, %s3219_s8  ;;  %v1829_v34 = vadd.f32 %v1828_v33, %v1827_v37 }
 0x2c8   :  { %1845 = vrot.lane.b32.xlu1 %v1829_v34, %s3219_s8  ;;  %1839 = vrot.lane.b32.xlu0 %v1822_v32, %s3220_s9 }
 0x2cc   :  { %1853 = vrot.lane.b32.xlu1 %v1829_v34, %s3220_s9  ;;  %1849 = vrot.lane.b32.xlu0 %v1829_v34, %s3218_s2 }
 0x336   :  { %v1836_v35 = vpop.permute.xlu1 %1835  ;;  %v1832_v30 = vpop.permute.xlu0 %1831 }
 0x337   :  { %v1834_v19 = vadd.f32 %v1832_v30, %v1822_v32 }
 0x339   :  { %v1838_v41 = vadd.f32 %v1836_v35, %v1834_v19  ;;  %v3145_v19 = vld [vmem:[%s4293_s3 + $0x38] sm:$0xff]  }
 0x33a   :  { %v1840_v8 = vpop.permute.xlu0 %1839  ;;  %v1846_v56 = vpop.permute.xlu1 %1845 }
 0x33b   :  { %v1842_v31 = vadd.f32 %v1840_v8, %v1838_v41  ;;  %v3146_v41 = vld [vmem:[%s4293_s3 + $0x78] sm:$0xff]   ;;  %v3224_v8 = vmov 0.0  }
 0x33c   :  { %2843 = vmatprep.subr.bf16.mxu0 %v3224_v8  ;;  %2823 = vmatprep.subr.bf16.mxu1 %v3224_v8 }
 0x33d   :  { %v1843_v16 = vadd.f32 %v1842_v31, %v1829_v34  ;;  %2844 = vmatpush3.bf16.msra.mxu0 %v3145_v19  ;;  %2824 = vmatpush3.bf16.msra.mxu1 %v3146_v41  ;;  %v3147_v31 = vld [vmem:[%s4293_s3 + $0x30] sm:$0xff]  }
 0x33e   :  { %v1850_v43 = vpop.permute.xlu0 %1849  ;;  %v1854_v47 = vpop.permute.xlu1 %1853  ;;  %2845 = vmatprep.subr.bf16.mxu0 %v3224_v8  ;;  %2825 = vmatprep.subr.bf16.mxu1 %v3224_v8 }
 0x33f   :  { %v1848_v42 = vadd.f32 %v1846_v56, %v1843_v16  ;;  %v3148_v56 = vld [vmem:[%s4293_s3 + $0x70] sm:$0xff]   ;;  %2859 = vmatprep.mubr.msk.bf16.mxu0 %vm3225_vm1, %v3224_v8  ;;  %2839 = vmatprep.mubr.msk.bf16.mxu1 %vm3225_vm1, %v3224_v8  ;;  %v3149_v16 = vld [vmem:[%s4293_s3 + $0x28] sm:$0xff]  }
 0x341   :  { %v1852_v46 = vadd.f32 %v1850_v43, %v1848_v42  ;;  %2846 = vmatpush3.bf16.msra.mxu0 %v3147_v31  ;;  %2826 = vmatpush3.bf16.msra.mxu1 %v3148_v56  ;;  %v3150_v42 = vld [vmem:[%s4293_s3 + $0x68] sm:$0xff]   ;;  %v3151_v43 = vld [vmem:[%s4293_s3 + $0x20] sm:$0xff]  }
 0x342   :  { %2847 = vmatprep.subr.bf16.mxu0 %v3224_v8  ;;  %2827 = vmatprep.subr.bf16.mxu1 %v3224_v8 }
 0x343   :  { %v1856_v51 = vadd.f32 %v1854_v47, %v1852_v46  ;;  %v3152_v46 = vld [vmem:[%s4293_s3 + $0x60] sm:$0xff]   ;;  %v3153_v47 = vld [vmem:[%s4293_s3 + $0x18] sm:$0xff]  }
 0x345   :  { %v1857_v53 = vmul.f32 0.0078125, %v1856_v51  ;;  %2848 = vmatpush3.bf16.msra.mxu0 %v3149_v16  ;;  %2828 = vmatpush3.bf16.msra.mxu1 %v3150_v42  ;;  %v3154_v51 = vld [vmem:[%s4293_s3 + $0x58] sm:$0xff]  }
 0x346   :  { %2849 = vmatprep.subr.bf16.mxu0 %v3224_v8  ;;  %2829 = vmatprep.subr.bf16.mxu1 %v3224_v8 }
 0x347   :  { %1862 = vrot.lane.b32.xlu1 %v1857_v53, %s3221_s10  ;;  %1859 = vrot.lane.b32.xlu0 %v1857_v53, %s3222_s11 }
 0x349   :  { %2850 = vmatpush3.bf16.msra.mxu0 %v3151_v43  ;;  %2830 = vmatpush3.bf16.msra.mxu1 %v3152_v46 }
 0x34a   :  { %2851 = vmatprep.subr.bf16.mxu0 %v3224_v8  ;;  %2831 = vmatprep.subr.bf16.mxu1 %v3224_v8 }
 0x34b   :  { %1865 = vrot.lane.b32.xlu0 %v1857_v53, %s3223_s12 }
 0x34d   :  { %2852 = vmatpush3.bf16.msra.mxu0 %v3153_v47  ;;  %2832 = vmatpush3.bf16.msra.mxu1 %v3154_v51 }
 0x34e   :  { %2853 = vmatprep.subr.bf16.mxu0 %v3224_v8  ;;  %2833 = vmatprep.subr.bf16.mxu1 %v3224_v8 }
 0x3b9   :  { %v1860_v59 = vpop.permute.xlu0 %1859  ;;  %v1863_v14 = vpop.permute.xlu1 %1862 }
 0x3ba   :  { %v1869_v17 = vsel %vm1868_vm12, %v1857_v53, %v1860_v59  ;;  %v3155_v53 = vld [vmem:[%s4293_s3 + $0x10] sm:$0xff]  }
 0x3bb   :  { %v1871_v3 = vsel %vm1870_vm13, %v1869_v17, %v1863_v14  ;;  %v3156_v59 = vld [vmem:[%s4293_s3 + $0x50] sm:$0xff]   ;;  %2854 = vmatpush3.bf16.msra.mxu0 %v3155_v53  ;;  %v3157_v14 = vld [vmem:[%s4293_s3 + $0x8] sm:$0xff]  }
 0x3bc   :  { %2834 = vmatpush3.bf16.msra.mxu1 %v3156_v59  ;;  %v3158_v17 = vld [vmem:[%s4293_s3 + $0x48] sm:$0xff]   ;;  %2855 = vmatprep.subr.bf16.mxu0 %v3224_v8 }
 0x3bd   :  { %v1866_v13 = vpop.permute.xlu0 %1865  ;;  %2835 = vmatprep.subr.bf16.mxu1 %v3224_v8 }
 0x3be   :  { %v1873_v6 = vsel %vm1872_vm14, %v1871_v3, %v1866_v13  ;;  %v3159_v3 = vld [vmem:[%s4293_s3] sm:$0xff]  }
 0x3bf   :  { %v1875_v57 = vsel %vm1874_vm0, %v1873_v6, 0.0  ;;  %2856 = vmatpush3.bf16.msra.mxu0 %v3157_v14  ;;  %v3160_v13 = vld [vmem:[%s4293_s3 + $0x40] sm:$0xff]  }
 0x3c0   :  { %v1879_v5 = vrot.slane %v1875_v57, %v1878_v0  ;;  %2836 = vmatpush3.bf16.msra.mxu1 %v3158_v17  ;;  %2857 = vmatprep.subr.bf16.mxu0 %v3224_v8 }
 0x3c1   :  { %2837 = vmatprep.subr.bf16.mxu1 %v3224_v8 }
 0x3c2   :  { %v4033_v9 = vsub.f32 %v1812_v61, %v1879_v5  ;;  %v4035_v54 = vsub.f32 %v1813_v24, %v1879_v5  ;;  %v4038_v62 = vsub.f32 %v4014_v23, %v1879_v5  ;;  %v4040_v63 = vsub.f32 %v1815_v22, %v1879_v5 }
 0x3c3   :  { %2858 = vmatpush3.bf16.msra.mxu0 %v3159_v3 }
 0x3c4   :  { %v1884_v20 = vmul.f32 %v4033_v9, %v4033_v9  ;;  %v1885_v52 = vmul.f32 %v4035_v54, %v4035_v54  ;;  %v1886_v25 = vmul.f32 %v4038_v62, %v4038_v62  ;;  %v1887_v29 = vmul.f32 %v4040_v63, %v4040_v63  ;;  %2838 = vmatpush3.bf16.msra.mxu1 %v3160_v13 }
 0x3c5   :  { %2883 = vmatprep.subr.bf16.mxu0 %v3224_v8  ;;  %2863 = vmatprep.subr.bf16.mxu1 %v3224_v8 }
 0x3c6   :  { %v1888_v50 = vadd.f32 %v1886_v25, %v1884_v20  ;;  %v1895_v10 = vadd.f32 %v1887_v29, %v1885_v52 }
 0x3c8   :  { %v1889_v12 = vrot.slane %v1888_v50, 4  ;;  %v1896_v4 = vrot.slane %v1895_v10, 4 }
 0x3ca   :  { %v1890_v36 = vadd.f32 %v1889_v12, %v1888_v50  ;;  %v1897_v49 = vadd.f32 %v1896_v4, %v1895_v10 }
 0x3cc   :  { %v1891_v38 = vrot.slane %v1890_v36, 2  ;;  %v1898_v27 = vrot.slane %v1897_v49, 2 }
 0x3ce   :  { %v1892_v45 = vadd.f32 %v1891_v38, %v1890_v36  ;;  %v1899_v18 = vadd.f32 %v1898_v27, %v1897_v49  ;;  %v1972_v49 = vsub.s32 1, %v3557_v15 }
 0x3d0   :  { %v1893_v21 = vrot.slane %v1892_v45, 1  ;;  %v1900_v23 = vrot.slane %v1899_v18, 1 }
 0x3d2   :  { %v1894_v61 = vadd.f32 %v1893_v21, %v1892_v45  ;;  %v1901_v48 = vadd.f32 %v1900_v23, %v1899_v18 }
 0x3d4   :  { %1907 = vrot.lane.b32.xlu0 %v1894_v61, %s3218_s2  ;;  %1903 = vrot.lane.b32.xlu1 %v1894_v61, %s3219_s8 }
 0x3d8   :  { %1917 = vrot.lane.b32.xlu0 %v1901_v48, %s3219_s8  ;;  %1911 = vrot.lane.b32.xlu1 %v1894_v61, %s3220_s9 }
 0x3dc   :  { %1925 = vrot.lane.b32.xlu0 %v1901_v48, %s3220_s9  ;;  %1921 = vrot.lane.b32.xlu1 %v1901_v48, %s3218_s2 }
 0x3e0   :  { %1957 = vrot.lane.b32.xlu0 %v4059_v1, %s3222_s11 }
 0x446   :  { %v1908_v24 = vpop.permute.xlu0 %1907  ;;  %v1904_v39 = vpop.permute.xlu1 %1903 }
 0x447   :  { %v1906_v22 = vadd.f32 %v1904_v39, %v1894_v61 }
 0x449   :  { %v1910_v26 = vadd.f32 %v1908_v24, %v1906_v22 }
 0x44a   :  { %v1912_v7 = vpop.permute.xlu1 %1911  ;;  %v1918_v60 = vpop.permute.xlu0 %1917 }
 0x44b   :  { %v1914_v58 = vadd.f32 %v1912_v7, %v1910_v26 }
 0x44d   :  { %v1915_v40 = vadd.f32 %v1914_v58, %v1901_v48 }
 0x44e   :  { %v1922_v11 = vpop.permute.xlu1 %1921  ;;  %v1926_v37 = vpop.permute.xlu0 %1925 }
 0x44f   :  { %v1920_v55 = vadd.f32 %v1918_v60, %v1915_v40 }
 0x451   :  { %v1924_v28 = vadd.f32 %v1922_v11, %v1920_v55 }
 0x452   :  { %v1958_v6 = vpop.permute.xlu0 %1957 }
 0x453   :  { %v1928_v44 = vadd.f32 %v1926_v37, %v1924_v28  ;;  %v1966_v36 = vsel %vm1868_vm12, %v4059_v1, %v1958_v6 }
 0x455   :  { %v1929_v32 = vmul.f32 0.0078125, %v1928_v44 }
 0x457   :  { %v1930_v33 = vmax.f32 %v1929_v32, 0.0 }
 0x459   :  { %v1931_v34 = vadd.f32 1e-05, %v1930_v33 }
 0x45b   :  { %3185 = vrsqrt.f32 %v1931_v34 }
 0x468   :  { %v3186_v35 = vpop.eup %3185 }
 0x469   :  { %v4064_v30 = vmul.f32 %v4059_v1, %v3186_v35 }
 0x46b   :  { %1938 = vrot.lane.b32.xlu0 %v4064_v30, %s3221_s10  ;;  %1935 = vrot.lane.b32.xlu1 %v4064_v30, %s3222_s11 }
 0x46f   :  { %1941 = vrot.lane.b32.xlu1 %v4064_v30, %s3223_s12  ;;  %1963 = vrot.lane.b32.xlu0 %v4059_v1, %s3223_s12 }
 0x473   :  { %1960 = vrot.lane.b32.xlu1 %v4059_v1, %s3221_s10 }
 0x4dd   :  { %v1936_v57 = vpop.permute.xlu1 %1935  ;;  %v1939_v5 = vpop.permute.xlu0 %1938 }
 0x4de   :  { %v1944_v20 = vsel %vm1868_vm12, %v4064_v30, %v1936_v57 }
 0x4df   :  { %v1945_v52 = vsel %vm1870_vm13, %v1944_v20, %v1939_v5 }
 0x4e1   :  { %v1942_v25 = vpop.permute.xlu1 %1941  ;;  %v1964_v4 = vpop.permute.xlu0 %1963 }
 0x4e2   :  { %v1946_v29 = vsel %vm1872_vm14, %v1945_v52, %v1942_v25 }
 0x4e3   :  { %v1947_v50 = vsel %vm1874_vm0, %v1946_v29, 0.0 }
 0x4e4   :  { %v1951_v10 = vrot.slane %v1947_v50, %v1878_v0 }
 0x4e5   :  { %v1961_v12 = vpop.permute.xlu1 %1960 }
 0x4e6   :  { %v1967_v38 = vsel %vm1870_vm13, %v1966_v36, %v1961_v12  ;;  %v1952_v45 = vmul.f32 %v1951_v10, %v4033_v9  ;;  %v1953_v21 = vmul.f32 %v1951_v10, %v4035_v54  ;;  %v1954_v61 = vmul.f32 %v1951_v10, %v4038_v62 }
 0x4e7   :  { %v1968_v27 = vsel %vm1872_vm14, %v1967_v38, %v1964_v4  ;;  %v1955_v0 = vmul.f32 %v1951_v10, %v4040_v63 }
 0x4e8   :  { %v1969_v18 = vsel %vm1874_vm0, %v1968_v27, 0.0 }
 0x4e9   :  { %v1973_v23 = vrot.slane %v1969_v18, %v1972_v49 }
 0x4eb   :  { %v1974_v48 = vadd.f32 %v1973_v23, %v1952_v45  ;;  %v1975_v24 = vadd.f32 %v1973_v23, %v1953_v21  ;;  %v1976_v39 = vadd.f32 %v1973_v23, %v1954_v61  ;;  %v1977_v22 = vadd.f32 %v1973_v23, %v1955_v0 }
 0x4ed   :  { %v1978_v26 = vmax.f32 %v1974_v48, %v1975_v24  ;;  %v1979_v7 = vmax.f32 %v1976_v39, %v1977_v22 }
 0x4ef   :  { %v1982_v58 = vcombine.high %v1978_v26, %v1978_v26  ;;  %v1989_v60 = vrot.slane %v1978_v26, %v3560_v2  ;;  %v1999_v40 = vcombine.high %v1979_v7, %v1979_v7  ;;  %v2006_v9 = vrot.slane %v1979_v7, %v3560_v2 }
 0x4f1   :  { %v1997_v55 = vcombine.high %v1989_v60, %v1989_v60  ;;  %v2014_v11 = vcombine.high %v2006_v9, %v2006_v9  ;;  %v1996_v54 = vrot.slane %v1982_v58, %v3560_v2  ;;  %v2024_v62 = vsel %vm531_vm9, %v1989_v60, -inf }
 0x4f2   :  { %v2052_v63 = vsel %vm531_vm9, %v2006_v9, -inf  ;;  %v2013_v28 = vrot.slane %v1999_v40, %v3560_v2  ;;  %v2025_v37 = vrot.slane %v2024_v62, 4 }
 0x4f3   :  { %v2031_v44 = vsel %vm531_vm9, %v1997_v55, -inf  ;;  %v2053_v33 = vrot.slane %v2052_v63, 4  ;;  %v2059_v34 = vsel %vm531_vm9, %v2014_v11, -inf  ;;  %v1998_v19 = vcombine.high %v1996_v54, %v1996_v54 }
 0x4f4   :  { %v2032_v32 = vrot.slane %v2031_v44, 4  ;;  %v2026_v35 = vmax.f32 %v2024_v62, %v2025_v37  ;;  %v2060_v30 = vrot.slane %v2059_v34, 4  ;;  %v2015_v56 = vcombine.high %v2013_v28, %v2013_v28 }
 0x4f5   :  { %v2054_v31 = vmax.f32 %v2052_v63, %v2053_v33  ;;  %v2038_v42 = vsel %vm531_vm9, %v1996_v54, -inf  ;;  %v2045_v59 = vsel %vm531_vm9, %v1998_v19, -inf  ;;  %v2066_v57 = vsel %vm531_vm9, %v2013_v28, -inf  ;;  %v3161_v63 = vld [vmem:[%s4293_s3 + $0xf8] sm:$0xff]   ;;  %v3163_v19 = vld [vmem:[%s4293_s3 + $0xf0] sm:$0xff]  }
 0x4f6   :  { %v2033_v41 = vmax.f32 %v2031_v44, %v2032_v32  ;;  %v2027_v16 = vrot.slane %v2026_v35, 2  ;;  %v2061_v43 = vmax.f32 %v2059_v34, %v2060_v30  ;;  %v2039_v53 = vrot.slane %v2038_v42, 4  ;;  %v3162_v33 = vld [vmem:[%s4293_s3 + $0xb8] sm:$0xff]  }
 0x4f7   :  { %v2055_v46 = vrot.slane %v2054_v31, 2  ;;  %v2073_v3 = vsel %vm531_vm9, %v2015_v56, -inf  ;;  %v2046_v52 = vrot.slane %v2045_v59, 4  ;;  %v2067_v36 = vrot.slane %v2066_v57, 4  ;;  %v3164_v56 = vld [vmem:[%s4293_s3 + $0xb0] sm:$0xff]  }
 0x4f8   :  { %v2034_v47 = vrot.slane %v2033_v41, 2  ;;  %v2028_v2 = vmax.f32 %v2026_v35, %v2027_v16  ;;  %v2062_v51 = vrot.slane %v2061_v43, 2  ;;  %v2040_v50 = vmax.f32 %v2038_v42, %v2039_v53 }
 0x4f9   :  { %v2056_v14 = vmax.f32 %v2054_v31, %v2055_v46  ;;  %v2074_v10 = vrot.slane %v2073_v3, 4  ;;  %v2047_v61 = vmax.f32 %v2045_v59, %v2046_v52  ;;  %v2068_v39 = vmax.f32 %v2066_v57, %v2067_v36  ;;  %v3167_v59 = vld [vmem:[%s4293_s3 + $0xe0] sm:$0xff]   ;;  %v3170_v52 = vld [vmem:[%s4293_s3 + $0x98] sm:$0xff]  }
 0x4fa   :  { %v2035_v17 = vmax.f32 %v2033_v41, %v2034_v47  ;;  %v2029_v13 = vrot.slane %v2028_v2, 1  ;;  %v2063_v6 = vmax.f32 %v2061_v43, %v2062_v51  ;;  %v2041_v28 = vrot.slane %v2040_v50, 2  ;;  %v3165_v43 = vld [vmem:[%s4293_s3 + $0xe8] sm:$0xff]  }
 0x4fb   :  { %v2057_v5 = vrot.slane %v2056_v14, 1  ;;  %v2075_v24 = vmax.f32 %v2073_v3, %v2074_v10  ;;  %v2048_v11 = vrot.slane %v2047_v61, 2  ;;  %v2069_v37 = vrot.slane %v2068_v39, 2  ;;  %v3168_v3 = vld [vmem:[%s4293_s3 + $0xa0] sm:$0xff]  }
 0x4fc   :  { %v2036_v20 = vrot.slane %v2035_v17, 1  ;;  %v2030_v25 = vmax.f32 %v2028_v2, %v2029_v13  ;;  %v2064_v29 = vrot.slane %v2063_v6, 1  ;;  %v2042_v41 = vmax.f32 %v2040_v50, %v2041_v28  ;;  %v3166_v2 = vld [vmem:[%s4293_s3 + $0xa8] sm:$0xff]   ;;  %v3169_v13 = vld [vmem:[%s4293_s3 + $0xd8] sm:$0xff]   ;;  %v3171_v50 = vld [vmem:[%s4293_s3 + $0xd0] sm:$0xff]  }
 0x4fd   :  { %v2058_v12 = vmax.f32 %v2056_v14, %v2057_v5  ;;  %v2076_v54 = vrot.slane %v2075_v24, 2  ;;  %v2049_v35 = vmax.f32 %v2047_v61, %v2048_v11  ;;  %v2070_v31 = vmax.f32 %v2068_v39, %v2069_v37  ;;  %v3182_v11 = vld [vmem:[%s4294_s4 + $0x10] sm:$0xff]  }
 0x4fe   :  { %v2037_v4 = vmax.f32 %v2035_v17, %v2036_v20  ;;  %vm2080_vm2 = vcmp.ge.f32.partialorder %v2030_v25, 0.0  ;;  %v2088_v49 = vmul.f32 0.01, %v2030_v25  ;;  %v2065_v38 = vmax.f32 %v2063_v6, %v2064_v29 }
 0x4ff   :  { %vm2084_vm3 = vcmp.ge.f32.partialorder %v2058_v12, 0.0  ;;  %v2092_v27 = vmul.f32 0.01, %v2058_v12  ;;  %v2077_v30 = vmax.f32 %v2075_v24, %v2076_v54  ;;  %v2050_v16 = vrot.slane %v2049_v35, 1  ;;  %v3176_v24 = vld [vmem:[%s4293_s3 + $0x80] sm:$0xff]   ;;  %v3183_v54 = vld [vmem:[%s4294_s4 + $0x8] sm:$0xff]  }
 0x500   :  { %vm2081_vm4 = vcmp.ge.f32.partialorder %v2037_v4, 0.0  ;;  %v2089_v45 = vmul.f32 0.01, %v2037_v4  ;;  %v2096_v18 = vsel %vm2080_vm2, %v2030_v25, %v2088_v49  ;;  %vm2085_vm5 = vcmp.ge.f32.partialorder %v2065_v38, 0.0 }
 0x501   :  { %v2093_v21 = vmul.f32 0.01, %v2065_v38  ;;  %v2100_v0 = vsel %vm2084_vm3, %v2058_v12, %v2092_v27  ;;  %v2104_v23 = vpack.c.bf16 %v2096_v18, %v2096_v18  ;;  %v2078_v42 = vrot.slane %v2077_v30, 1  ;;  %v3174_v18 = vld [vmem:[%s4293_s3 + $0x88] sm:$0xff]  }
 0x502   :  { %v2097_v48 = vsel %vm2081_vm4, %v2037_v4, %v2089_v45  ;;  %v2105_v22 = vpack.c.bf16 %v2100_v0, %v2100_v0  ;;  %v2043_v46 = vrot.slane %v2042_v41, 1  ;;  %v2071_v47 = vrot.slane %v2070_v31, 1  ;;  %v3172_v4 = vld [vmem:[%s4293_s3 + $0x90] sm:$0xff]   ;;  %v3173_v45 = vld [vmem:[%s4293_s3 + $0xc8] sm:$0xff]  }
 0x503   :  { %v2101_v26 = vsel %vm2085_vm5, %v2065_v38, %v2093_v21  ;;  %v2106_v7 = vpack.c.bf16 %v2097_v48, %v2097_v48  ;;  %v2205_v58 = vunpack.c.l.b16 %v2104_v23  ;;  %v2051_v51 = vmax.f32 %v2049_v35, %v2050_v16  ;;  %v3175_v48 = vld [vmem:[%s4293_s3 + $0xc0] sm:$0xff]  }
 0x504   :  { %v2107_v60 = vpack.c.bf16 %v2101_v26, %v2101_v26  ;;  %v2206_v40 = vunpack.c.l.b16 %v2105_v22  ;;  %v2079_v53 = vmax.f32 %v2077_v30, %v2078_v42  ;;  %v2044_v14 = vmax.f32 %v2042_v41, %v2043_v46 }
 0x505   :  { %v2110_v9 = vunpack.c.l.b16 %v2106_v7  ;;  %v2072_v17 = vmax.f32 %v2070_v31, %v2071_v47  ;;  %v2091_v6 = vmul.f32 0.01, %v2051_v51  ;;  %vm2083_vm6 = vcmp.ge.f32.partialorder %v2051_v51, 0.0 }
 0x506   :  { %v2111_v55 = vunpack.c.l.b16 %v2107_v60  ;;  %v2207_v62 = vsel %vm1011_vm15, %v2206_v40, %v2205_v58  ;;  %v2095_v57 = vmul.f32 0.01, %v2079_v53  ;;  %vm2087_vm7 = vcmp.ge.f32.partialorder %v2079_v53, 0.0  ;;  %v3177_v58 = vld [vmem:[%s4294_s4 + $0x38] sm:$0xff]   ;;  %v3178_v60 = vld [vmem:[%s4294_s4 + $0x30] sm:$0xff]   ;;  %v3179_v40 = vld [vmem:[%s4294_s4 + $0x28] sm:$0xff]  }
 0x507   :  { %v2208_v44 = vpack.c.b16 %v2207_v62, %v2207_v62  ;;  %v2090_v5 = vmul.f32 0.01, %v2044_v14  ;;  %v2094_v20 = vmul.f32 0.01, %v2072_v17  ;;  %vm2082_vm8 = vcmp.ge.f32.partialorder %v2044_v14, 0.0  ;;  %v3184_v62 = vld [vmem:[%s4294_s4] sm:$0xff]  }
 0x508   :  { %v2112_v32 = vsel %vm1011_vm15, %v2111_v55, %v2110_v9  ;;  %vm2086_vm10 = vcmp.ge.f32.partialorder %v2072_v17, 0.0  ;;  %v2099_v25 = vsel %vm2083_vm6, %v2051_v51, %v2091_v6  ;;  %v2103_v29 = vsel %vm2087_vm7, %v2079_v53, %v2095_v57  ;;  %v3180_v9 = vld [vmem:[%s4294_s4 + $0x20] sm:$0xff]   ;;  %v3181_v55 = vld [vmem:[%s4294_s4 + $0x18] sm:$0xff]   ;;  %s3226_s4 = smov [#allocation2]  }
 0x509   :  { %v2113_v34 = vpack.c.b16 %v2112_v32, %v2112_v32  ;;  %2860 = vmatmul.mubr.bf16.vlgmr.msra.gmra.mxu0 %v2208_v44  ;;  %v2098_v10 = vsel %vm2082_vm8, %v2044_v14, %v2090_v5  ;;  %v2102_v12 = vsel %vm2086_vm10, %v2072_v17, %v2094_v20  ;;  %v2396_v36 = vpack.c.bf16 %v2099_v25, %v2099_v25  ;;  %s2628_s10 = sshll.u32 %s3226_s4, 4  ;;  %s2629_s10 = int_to_ptr.vmem [resolvable:$true] %s2628_s10 }
 0x50a   :  { %2884 = vmatpush3.bf16.msra.mxu0 %v3161_v63  ;;  %2899 = vmatprep.mubr.msk.bf16.mxu0 %vm3225_vm1, %v3224_v8  ;;  %v2397_v49 = vpack.c.bf16 %v2103_v29, %v2103_v29  ;;  %v2298_v38 = vpack.c.bf16 %v2098_v10, %v2098_v10  ;;  %v2299_v27 = vpack.c.bf16 %v2102_v12, %v2102_v12  ;;  %s3190_s11 = scalar_lea.vmem %s2629_s10, 32  ;;  %p3195_p1 = scmp.lt.s32.totalorder %s2629_s10, %s2629_s10 }
 0x50b   :  { %2840 = vmatmul.mubr.bf16.vlgmr.msra.gmra.mxu1 %v2113_v34  ;;  %2885 = vmatprep.subr.bf16.mxu0 %v3224_v8  ;;  %v2400_v21 = vunpack.c.l.b16 %v2396_v36  ;;  %p3191_p0 = scmp.ne.s32.totalorder %s2629_s10, %s3190_s11  ;;  %p3196_p2 = scmp.lt.s32.totalorder %s3190_s11, %s3190_s11 }
 0x50c   :  { %2864 = vmatpush3.bf16.msra.mxu1 %v3162_v33  ;;  %2879 = vmatprep.mubr.msk.bf16.mxu1 %vm3225_vm1, %v3224_v8  ;;  %v2401_v61 = vunpack.c.l.b16 %v2397_v49  ;;  %v2302_v0 = vunpack.c.l.b16 %v2298_v38  ;;  %v2303_v23 = vunpack.c.l.b16 %v2299_v27  ;;  %v2518_v49 = vsub.s32 2, %v3557_v15 }
 0x50d   :  { %2865 = vmatprep.subr.bf16.mxu1 %v3224_v8  ;;  %v2523_v38 = vsub.s32 3, %v3557_v15  ;;  %p3197_p3 = por %p3196_p2, %p3195_p1 }
 0x50e   :  { %2886 = vmatpush3.bf16.msra.mxu0 %v3163_v19  ;;  %v2402_v39 = vsel %vm1011_vm15, %v2401_v61, %v2400_v21  ;;  %v2304_v22 = vsel %vm1011_vm15, %v2303_v23, %v2302_v0 }
 0x50f   :  { %2887 = vmatprep.subr.bf16.mxu0 %v3224_v8  ;;  %v2403_v26 = vpack.c.b16 %v2402_v39, %v2402_v39  ;;  %v2305_v7 = vpack.c.b16 %v2304_v22, %v2304_v22  ;;  %v2524_v21 = vrot.slane %v4059_v1, %v2523_v38  ;;  %p3198_p4 = pnand %p3197_p3, %p3191_p0 }
 0x510   :  { %2866 = vmatpush3.bf16.msra.mxu1 %v3164_v56 }
 0x511   :  { %2867 = vmatprep.subr.bf16.mxu1 %v3224_v8 }
 0x512   :  { %2888 = vmatpush3.bf16.msra.mxu0 %v3165_v43 }
 0x513   :  { %2889 = vmatprep.subr.bf16.mxu0 %v3224_v8 }
 0x514   :  { %2868 = vmatpush3.bf16.msra.mxu1 %v3166_v2 }
 0x515   :  { %2869 = vmatprep.subr.bf16.mxu1 %v3224_v8 }
 0x516   :  { %2890 = vmatpush3.bf16.msra.mxu0 %v3167_v59 }
 0x517   :  { %2891 = vmatprep.subr.bf16.mxu0 %v3224_v8 }
 0x518   :  { %2870 = vmatpush3.bf16.msra.mxu1 %v3168_v3 }
 0x519   :  { %2871 = vmatprep.subr.bf16.mxu1 %v3224_v8 }
 0x51a   :  { %2892 = vmatpush3.bf16.msra.mxu0 %v3169_v13 }
 0x51b   :  { %2893 = vmatprep.subr.bf16.mxu0 %v3224_v8 }
 0x51c   :  { %2872 = vmatpush3.bf16.msra.mxu1 %v3170_v52 }
 0x51d   :  { %2873 = vmatprep.subr.bf16.mxu1 %v3224_v8 }
 0x51e   :  { %2894 = vmatpush3.bf16.msra.mxu0 %v3171_v50 }
 0x51f   :  { %2895 = vmatprep.subr.bf16.mxu0 %v3224_v8 }
 0x520   :  { %2874 = vmatpush3.bf16.msra.mxu1 %v3172_v4 }
 0x521   :  { %2875 = vmatprep.subr.bf16.mxu1 %v3224_v8 }
 0x522   :  { %2896 = vmatpush3.bf16.msra.mxu0 %v3173_v45 }
 0x523   :  { %2897 = vmatprep.subr.bf16.mxu0 %v3224_v8 }
 0x524   :  { %2876 = vmatpush3.bf16.msra.mxu1 %v3174_v18 }
 0x525   :  { %2877 = vmatprep.subr.bf16.mxu1 %v3224_v8 }
 0x526   :  { %2898 = vmatpush3.bf16.msra.mxu0 %v3175_v48 }
 0x528   :  { %2878 = vmatpush3.bf16.msra.mxu1 %v3176_v24  ;;  %v2530_v24 = vsub.s32 4, %v3557_v15 }
 0x529   :  { %2903 = vmatprep.subr.bf16.mxu1 %v3224_v8  ;;  %2900 = vmatmul.mubr.bf16.vlgmr.msra.gmra.mxu0 %v2403_v26 }
 0x52a   :  { %v2531_v39 = vrot.slane %v4059_v1, %v2530_v24 }
 0x52b   :  { %2880 = vmatmul.mubr.bf16.vlgmr.msra.gmra.mxu1 %v2305_v7 }
 0x52c   :  { %2919 = vmatprep.mubr.msk.bf16.mxu1 %vm3225_vm1, %v3224_v8  ;;  %2904 = vmatpush3.bf16.msra.mxu1 %v3177_v58 }
 0x52d   :  { %2905 = vmatprep.subr.bf16.mxu1 %v3224_v8 }
 0x530   :  { %2906 = vmatpush3.bf16.msra.mxu1 %v3178_v60 }
 0x531   :  { %2907 = vmatprep.subr.bf16.mxu1 %v3224_v8 }
 0x534   :  { %2908 = vmatpush3.bf16.msra.mxu1 %v3179_v40 }
 0x535   :  { %2909 = vmatprep.subr.bf16.mxu1 %v3224_v8 }
 0x538   :  { %2910 = vmatpush3.bf16.msra.mxu1 %v3180_v9 }
 0x539   :  { %2911 = vmatprep.subr.bf16.mxu1 %v3224_v8 }
 0x53c   :  { %2912 = vmatpush3.bf16.msra.mxu1 %v3181_v55 }
 0x53d   :  { %2913 = vmatprep.subr.bf16.mxu1 %v3224_v8 }
 0x540   :  { %2914 = vmatpush3.bf16.msra.mxu1 %v3182_v11 }
 0x541   :  { %2915 = vmatprep.subr.bf16.mxu1 %v3224_v8 }
 0x544   :  { %2916 = vmatpush3.bf16.msra.mxu1 %v3183_v54 }
 0x545   :  { %2917 = vmatprep.subr.bf16.mxu1 %v3224_v8 }
 0x548   :  { %2918 = vmatpush3.bf16.msra.mxu1 %v3184_v62 }
 0x5c9   :  { %v2292_v63 = vpop.f32.mrf.mxu0 }
 0x5cb   :  { %v2197_v28 = vpop.f32.mrf.mxu1  ;;  %v2861_v37 = vpop.f32.mrf.mxu0 }
 0x5cc   :  { %v2293_v30 = vadd.f32 %v2292_v63, %v2197_v28 }
 0x5cd   :  { %v2841_v44 = vpop.f32.mrf.mxu1  ;;  %v2295_v32 = vpop.f32.mrf.mxu0 }
 0x5cf   :  { %v2200_v33 = vpop.f32.mrf.mxu1  ;;  %v2862_v34 = vpop.f32.mrf.mxu0 }
 0x5d1   :  { %v2842_v35 = vpop.f32.mrf.mxu1 }
 0x5e9   :  { %v2487_v19 = vpop.f32.mrf.mxu0 }
 0x5eb   :  { %v2389_v41 = vpop.f32.mrf.mxu1  ;;  %v2901_v56 = vpop.f32.mrf.mxu0 }
 0x5ec   :  { %v2395_v31 = vadd.f32 %v2389_v41, %v2293_v30 }
 0x5ed   :  { %v2881_v16 = vpop.f32.mrf.mxu1  ;;  %v2490_v43 = vpop.f32.mrf.mxu0 }
 0x5ee   :  { %v2493_v42 = vadd.f32 %v2487_v19, %v2395_v31 }
 0x5ef   :  { %v2392_v46 = vpop.f32.mrf.mxu1  ;;  %v2902_v47 = vpop.f32.mrf.mxu0 }
 0x5f0   :  { %v2494_v8 = vsel %vm531_vm9, %v2493_v42, 0.0 }
 0x5f1   :  { %v2495_v2 = vrot.slane %v2494_v8, 4  ;;  %v2882_v51 = vpop.f32.mrf.mxu1 }
 0x5f3   :  { %v2496_v53 = vadd.f32 %v2495_v2, %v2494_v8 }
 0x5f5   :  { %v2497_v59 = vrot.slane %v2496_v53, 2 }
 0x5f7   :  { %v2498_v14 = vadd.f32 %v2497_v59, %v2496_v53 }
 0x5f9   :  { %v2499_v17 = vrot.slane %v2498_v14, 1 }
 0x5fb   :  { %v2500_v3 = vadd.f32 %v2499_v17, %v2498_v14 }
 0x5fd   :  { %v2501_v13 = vmul.f32 0.5, %v2500_v3 }
 0x5ff   :  { %v2502_v6 = vsub.f32 %v2493_v42, %v2501_v13 }
 0x601   :  { %v2503_v57 = vmul.f32 %v2502_v6, %v2502_v6 }
 0x603   :  { %v2504_v5 = vsel %vm531_vm9, %v2503_v57, 0.0 }
 0x604   :  { %v2505_v20 = vrot.slane %v2504_v5, 4 }
 0x606   :  { %v2506_v52 = vadd.f32 %v2505_v20, %v2504_v5 }
 0x608   :  { %v2507_v25 = vrot.slane %v2506_v52, 2 }
 0x60a   :  { %v2508_v29 = vadd.f32 %v2507_v25, %v2506_v52 }
 0x60c   :  { %v2509_v50 = vrot.slane %v2508_v29, 1 }
 0x60e   :  { %v2510_v10 = vadd.f32 %v2509_v50, %v2508_v29 }
 0x610   :  { %v2511_v12 = vmul.f32 0.5, %v2510_v10 }
 0x612   :  { %v2512_v4 = vmax.f32 %v2511_v12, 0.0 }
 0x614   :  { %v2513_v36 = vadd.f32 1e-05, %v2512_v4 }
 0x616   :  { %3187 = vrsqrt.f32 %v2513_v36 }
 0x623   :  { %v3188_v27 = vpop.eup %3187 }
 0x624   :  { %v2515_v45 = vmul.f32 %v4059_v1, %v3188_v27 }
 0x626   :  { %v2519_v18 = vrot.slane %v2515_v45, %v2518_v49 }
 0x628   :  { %v2520_v61 = vmul.f32 %v2519_v18, %v2502_v6 }
 0x62a   :  { %v2525_v0 = vadd.f32 %v2524_v21, %v2520_v61 }
 0x62c   :  { %v2526_v23 = vmax.f32 %v2525_v0, 0.0 }
 0x62e   :  { %v2527_v48 = vpack.c.bf16 %v2526_v23, %v2526_v23 }
 0x630   :  { %2920 = vmatmul.mubr.bf16.vlgmr.msra.gmra.mxu1 %v2527_v48 }
 0x6f0   :  { %v2614_v22 = vpop.f32.mrf.mxu1 }
 0x6f1   :  { %v2615_v26 = vadd.f32 %v2614_v22, %v2531_v39 }
 0x6f2   :  { %v2921_v7 = vpop.f32.mrf.mxu1 }
 0x6f3   :  { %v2620_v58 = vmax.f32 %v2615_v26, 0.0 }
 0x6f4   :  { %v2617_v60 = vpop.f32.mrf.mxu1 }
 0x6f5   :  { %2621 = vst [vmem:[#allocation2] sm:$0x3] %v2620_v58 }
 0x6f6   :  { %v2922_v40 = vpop.f32.mrf.mxu1 }
 0x6f7   :  { %3201 = shalt.err (!%p3198_p4)
}
 0x6f8   :  { %2631 = dma.vmem_to_hbm [thread:$0]  %s2629_s10, 32, %s4296_s6, [#allocation3]  }
 0x6f9   :  { %3210 = dma.done.wait [#allocation3], 32  }
 0x6fa   :  { %3211 = vsyncadd [#allocation3], 4294967264 }
 0x6fb   :  { %2635 = vsyncpa [#allocation3], 1 }

</bundles_post_ra>
